<compile_context>
chip_gen: v6e
topology: v6e:2x2x1
jax: 0.10.0
libtpu: 0.0.40
codegen_flags: <defaults>
</compile_context>

<pallas_src>
import math

import jax
import jax.numpy as jnp
from jax.experimental import pallas as pl
from jax.experimental.pallas import tpu as pltpu

# ---------------- config (small, deterministic) ----------------
BATCH = 2
SEQ = 16
HIDDEN = 128
N_HEADS = 4
HEAD_DIM = HIDDEN // N_HEADS          # 32
HALF = HEAD_DIM // 2                  # 16
EXPANSION_RATIO = 2.0
FFN_HIDDEN = int(HIDDEN * EXPANSION_RATIO)   # 256
LN_EPS = 1e-5
ROTARY = True
CAUSAL = True
NEG_INF = -1e9

# The full-width RoPE roll trick below requires HEAD_DIM = 2*HALF and
# HIDDEN a multiple of HEAD_DIM (so the +/-HALF rolls never cross a head
# boundary on the lanes each select-branch keeps).
assert HIDDEN % HEAD_DIM == 0 and HEAD_DIM == 2 * HALF


def _rotate_half(x):
    half = x.shape[-1] // 2
    return jnp.concatenate([-x[:, half:], x[:, :half]], axis=-1)


# ---------------- Pallas kernel (single invocation, no grid) ----------------
def transformer_block_kernel(
    mask_ref, cos_ref, sin_ref, x_ref,
    wqkv_ref, wo_ref, ln_ref, wgu_ref, wd_ref,
    o_ref,
):
    x = x_ref[...]                               # [B*S, D] f32
    B, S = mask_ref.shape
    D = x.shape[-1]
    hd, F = HEAD_DIM, FFN_HIDDEN

    ln = ln_ref[...]                             # [4, D] f32 (packed)
    ln1w, ln1b, ln2w, ln2b = ln[0:1], ln[1:2], ln[2:3], ln[3:4]

    # ---- attention branch: pre-norm LayerNorm (f32) ----
    mu = jnp.mean(x, axis=-1, keepdims=True)
    var = jnp.mean((x - mu) ** 2, axis=-1, keepdims=True)
    h = (x - mu) * jax.lax.rsqrt(var + LN_EPS) * ln1w + ln1b

    # fused QKV: one [B*S, D] x [D, 3D] MXU push (bf16 operands, f32 acc)
    qkv = jnp.dot(h.astype(jnp.bfloat16), wqkv_ref[...],
                  preferred_element_type=jnp.float32)          # [B*S, 3D]
    scale = 1.0 / math.sqrt(hd)
    q = qkv[:, :D] * scale                       # scale commutes with RoPE
    k = qkv[:, D:2 * D]
    v = qkv[:, 2 * D:]

    # ---- RoPE at full [S, D] width: per-head rotate_half == two XLU rolls +
    #      one select; the (-x2 | +x1) half-sign is folded into sin_signed.
    #      Lanes that wrap at the array edge are discarded by the select.
    cos = cos_ref[...]                           # [S, D] f32
    sin_s = sin_ref[...]                         # [S, D] f32 (sign folded)
    lane = jax.lax.broadcasted_iota(jnp.int32, (S, D), 1)
    first_half = (lane % hd) < HALF

    def rope(t):                                 # t: [S, D] f32
        swapped = jnp.where(first_half,
                            pltpu.roll(t, shift=D - HALF, axis=1),
                            pltpu.roll(t, shift=HALF, axis=1))
        return t * cos + swapped * sin_s

    # ---- causal + key-padding bias built in-kernel from the [B, S] mask ----
    mask = mask_ref[...]                         # [B, S] f32
    row = jax.lax.broadcasted_iota(jnp.int32, (S, S), 0)
    col = jax.lax.broadcasted_iota(jnp.int32, (S, S), 1)
    if CAUSAL:
        causal_ok = col <= row
    else:
        causal_ok = jnp.full((S, S), True)

    # ---- attention: per-batch softmax; heads lane-concatenated, batches
    #      row-stacked, then ONE fused K=D out-projection.
    pv_rows = []
    for b in range(B):                           # static unroll (B small)
        r0 = b * S
        qb = rope(q[r0:r0 + S]) if ROTARY else q[r0:r0 + S]
        kb = rope(k[r0:r0 + S]) if ROTARY else k[r0:r0 + S]
        vb = v[r0:r0 + S].astype(jnp.bfloat16)
        qb = qb.astype(jnp.bfloat16)
        kb = kb.astype(jnp.bfloat16)
        key_ok = mask[b:b + 1, :] > 0.5          # [1, S]
        bias = jnp.where(jnp.logical_and(causal_ok, key_ok),
                         0.0, NEG_INF).astype(jnp.float32)     # [S, S]
        heads = []
        for hh in range(N_HEADS):                # static unroll
            sl = slice(hh * hd, (hh + 1) * hd)
            s = jnp.dot(qb[:, sl], kb[:, sl].T,
                        preferred_element_type=jnp.float32) + bias
            m = jnp.max(s, axis=-1, keepdims=True)
            p = jnp.exp(s - m)
            # approx reciprocal (EUP slot); fine for eval-level tolerance
            p = p * pl.reciprocal(jnp.sum(p, axis=-1, keepdims=True),
                                  approx=True)
            heads.append(jnp.dot(p.astype(jnp.bfloat16), vb[:, sl],
                                 preferred_element_type=jnp.float32))
        pv_rows.append(jnp.concatenate(heads, axis=-1))        # [S, D]
    pv = jnp.concatenate(pv_rows, axis=0)                      # [B*S, D]

    # single fused out-projection (K = D) + residual
    x1 = x + jnp.dot(pv.astype(jnp.bfloat16), wo_ref[...],
                     preferred_element_type=jnp.float32)       # [B*S, D]

    # ---- FFN branch: pre-norm + SwiGLU (fused gate/up), residual ----
    mu2 = jnp.mean(x1, axis=-1, keepdims=True)
    var2 = jnp.mean((x1 - mu2) ** 2, axis=-1, keepdims=True)
    h2 = (x1 - mu2) * jax.lax.rsqrt(var2 + LN_EPS) * ln2w + ln2b
    gu = jnp.dot(h2.astype(jnp.bfloat16), wgu_ref[...],
                 preferred_element_type=jnp.float32)           # [B*S, 2F]
    g = gu[:, :F]
    u = gu[:, F:]
    act = (g * jax.nn.sigmoid(g)) * u                          # SiLU(g) * up
    # TODO(synk): dropout (p>0) skipped -- eval semantics (identity).
    o_ref[...] = jnp.dot(act.astype(jnp.bfloat16), wd_ref[...],
                         preferred_element_type=jnp.float32) + x1


# ---------------- one-time prep (NOT in the per-call path) ----------------
def prepare_block(params, cos, sin):
    """Fuse + cast weights, pack LN params, tile/sign-fold rotary tables."""
    wqkv = jnp.concatenate([params["wq"], params["wk"], params["wv"]],
                           axis=1).astype(jnp.bfloat16)            # [D, 3D]
    wgu = jnp.concatenate([params["w_gate"], params["w_up"]],
                          axis=1).astype(jnp.bfloat16)             # [D, 2F]
    wo = params["wo"].astype(jnp.bfloat16)                         # [D, D]
    wd = params["w_down"].astype(jnp.bfloat16)                     # [F, D]
    ln = jnp.concatenate([params["ln1_w"], params["ln1_b"],
                          params["ln2_w"], params["ln2_b"]],
                         axis=0).astype(jnp.float32)               # [4, D]
    cos_full = jnp.tile(cos, (1, N_HEADS))                         # [S, D]
    sin_signed = jnp.tile(
        jnp.concatenate([-sin[:, :HALF], sin[:, HALF:]], axis=-1),
        (1, N_HEADS))                                              # [S, D]
    return dict(wqkv=wqkv, wo=wo, wgu=wgu, wd=wd, ln=ln,
                cos=cos_full, sin=sin_signed)


# ---------------- jitted call path: reshape -> pallas_call -> reshape ------
@jax.jit
def transformer_block(x, attention_mask, prep):
    B, S, D = x.shape
    x_flat = x.reshape(B * S, D)                 # fold batch into token axis
    y = pl.pallas_call(
        transformer_block_kernel,
        out_shape=jax.ShapeDtypeStruct((B * S, D), jnp.float32),
    )(
        attention_mask.astype(jnp.float32),      # [B, S]
        prep["cos"], prep["sin"], x_flat,
        prep["wqkv"], prep["wo"], prep["ln"], prep["wgu"], prep["wd"],
    )
    return y.reshape(B, S, D)


# ---------------- pure-JAX f32 reference (module semantics) ----------------
def transformer_block_ref(x, attention_mask, params, cos, sin):
    def one(xb, mb):
        mu = jnp.mean(xb, -1, keepdims=True)
        var = jnp.mean((xb - mu) ** 2, -1, keepdims=True)
        h = (xb - mu) * jax.lax.rsqrt(var + LN_EPS) * params["ln1_w"] + params["ln1_b"]
        q = h @ params["wq"]; k = h @ params["wk"]; v = h @ params["wv"]
        S = xb.shape[0]
        row = jnp.arange(S)[:, None]; col = jnp.arange(S)[None, :]
        allowed = (mb > 0.5)[None, :]
        if CAUSAL:
            allowed = jnp.logical_and(col <= row, allowed)
        outs = []
        for hh in range(N_HEADS):
            sl = slice(hh * HEAD_DIM, (hh + 1) * HEAD_DIM)
            qh, kh, vh = q[:, sl], k[:, sl], v[:, sl]
            if ROTARY:
                qh = qh * cos + _rotate_half(qh) * sin
                kh = kh * cos + _rotate_half(kh) * sin
            s = (qh @ kh.T) / math.sqrt(HEAD_DIM)
            s = jnp.where(allowed, s, NEG_INF)
            p = jax.nn.softmax(s, axis=-1)
            outs.append(p @ vh)
        x1 = jnp.concatenate(outs, -1) @ params["wo"] + xb
        mu2 = jnp.mean(x1, -1, keepdims=True)
        var2 = jnp.mean((x1 - mu2) ** 2, -1, keepdims=True)
        h2 = (x1 - mu2) * jax.lax.rsqrt(var2 + LN_EPS) * params["ln2_w"] + params["ln2_b"]
        g = h2 @ params["w_gate"]; u = h2 @ params["w_up"]
        return ((g * jax.nn.sigmoid(g)) * u) @ params["w_down"] + x1
    return jax.vmap(one)(x, attention_mask)


def make_params(key):
    ks = jax.random.split(key, 8)
    std = 0.02
    D, F = HIDDEN, FFN_HIDDEN
    return {
        "wq": jax.random.normal(ks[0], (D, D), jnp.float32) * std,
        "wk": jax.random.normal(ks[1], (D, D), jnp.float32) * std,
        "wv": jax.random.normal(ks[2], (D, D), jnp.float32) * std,
        "wo": jax.random.normal(ks[3], (D, D), jnp.float32) * std,
        "ln1_w": jnp.ones((1, D), jnp.float32),
        "ln1_b": jnp.zeros((1, D), jnp.float32),
        "ln2_w": jnp.ones((1, D), jnp.float32),
        "ln2_b": jnp.zeros((1, D), jnp.float32),
        "w_gate": jax.random.normal(ks[4], (D, F), jnp.float32) * std,
        "w_up": jax.random.normal(ks[5], (D, F), jnp.float32) * std,
        "w_down": jax.random.normal(ks[6], (F, D), jnp.float32) * std,
    }


def make_rotary(seq, head_dim):
    half = head_dim // 2
    inv_freq = 1.0 / (10000.0 ** (jnp.arange(0, half, dtype=jnp.float32) / half))
    pos = jnp.arange(seq, dtype=jnp.float32)
    freqs = pos[:, None] * inv_freq[None, :]
    emb = jnp.concatenate([freqs, freqs], axis=-1)     # [S, head_dim]
    return jnp.cos(emb), jnp.sin(emb)


if __name__ == "__main__":
    key = jax.random.PRNGKey(0)
    kx, kp = jax.random.split(key)

    x = jax.random.normal(kx, (BATCH, SEQ, HIDDEN), jnp.float32)
    # key-padding mask: 1.0 = attend, last 3 tokens of batch 1 masked out
    attention_mask = jnp.ones((BATCH, SEQ), jnp.float32)
    attention_mask = attention_mask.at[1, SEQ - 3:].set(0.0)

    params = make_params(kp)
    cos, sin = make_rotary(SEQ, HEAD_DIM)

    # one-time prep (fused bf16 weights, packed LN, tiled rotary tables)
    prep = prepare_block(params, cos, sin)
    prep = jax.tree_util.tree_map(jax.block_until_ready, prep)

    out = transformer_block(x, attention_mask, prep)
    out = jax.block_until_ready(out)

    ref = transformer_block_ref(x, attention_mask, params, cos, sin)
    assert out.shape == (BATCH, SEQ, HIDDEN)
    # bf16 matmul operands (f32 accumulation) + approx softmax reciprocal ->
    # compare against the f32 reference with a bf16-appropriate tolerance.
    assert jnp.allclose(out, ref, atol=2e-2, rtol=2e-2), \
        float(jnp.max(jnp.abs(out - ref)))

    print("KERNEL_OK")
</pallas_src>

<mosaic_0001>
module attributes {stable_mosaic.version = 11 : i64} {
  func.func @transformer_block_kernel(%arg0: memref<2x16xf32, #tpu.memory_space<vmem>>, %arg1: memref<16x128xf32, #tpu.memory_space<vmem>>, %arg2: memref<16x128xf32, #tpu.memory_space<vmem>>, %arg3: memref<32x128xf32, #tpu.memory_space<vmem>>, %arg4: memref<128x384xbf16, #tpu.memory_space<vmem>>, %arg5: memref<128x128xbf16, #tpu.memory_space<vmem>>, %arg6: memref<4x128xf32, #tpu.memory_space<vmem>>, %arg7: memref<128x512xbf16, #tpu.memory_space<vmem>>, %arg8: memref<256x128xbf16, #tpu.memory_space<vmem>>, %arg9: memref<32x128xf32, #tpu.memory_space<vmem>>) attributes {dimension_semantics = [], scalar_prefetch = 0 : i64, scratch_operands = 0 : i64, tpu.core_type = #tpu.core_type<tc>} {
    %c0 = arith.constant 0 : index
    %c0_0 = arith.constant 0 : index
    %0 = vector.load %arg3[%c0, %c0_0] : memref<32x128xf32, #tpu.memory_space<vmem>>, vector<32x128xf32>
    %c0_1 = arith.constant 0 : index
    %c0_2 = arith.constant 0 : index
    %1 = vector.load %arg6[%c0_1, %c0_2] : memref<4x128xf32, #tpu.memory_space<vmem>>, vector<4x128xf32>
    %2 = vector.extract_strided_slice %1 {offsets = [0, 0], sizes = [1, 128], strides = [1, 1]} : vector<4x128xf32> to vector<1x128xf32>
    %3 = vector.extract_strided_slice %1 {offsets = [1, 0], sizes = [1, 128], strides = [1, 1]} : vector<4x128xf32> to vector<1x128xf32>
    %4 = vector.extract_strided_slice %1 {offsets = [2, 0], sizes = [1, 128], strides = [1, 1]} : vector<4x128xf32> to vector<1x128xf32>
    %5 = vector.extract_strided_slice %1 {offsets = [3, 0], sizes = [1, 128], strides = [1, 1]} : vector<4x128xf32> to vector<1x128xf32>
    %cst = arith.constant dense<0.000000e+00> : vector<32xf32>
    %6 = vector.multi_reduction <add>, %0, %cst [1] : vector<32x128xf32> to vector<32xf32>
    %7 = vector.shape_cast %6 : vector<32xf32> to vector<32x1xf32>
    %cst_3 = arith.constant 1.280000e+02 : f32
    %8 = vector.broadcast %cst_3 : f32 to vector<32x1xf32>
    %9 = arith.divf %7, %8 : vector<32x1xf32>
    %10 = vector.broadcast %9 : vector<32x1xf32> to vector<32x128xf32>
    %11 = arith.subf %0, %10 : vector<32x128xf32>
    %12 = arith.mulf %11, %11 : vector<32x128xf32>
    %cst_4 = arith.constant dense<0.000000e+00> : vector<32xf32>
    %13 = vector.multi_reduction <add>, %12, %cst_4 [1] : vector<32x128xf32> to vector<32xf32>
    %14 = vector.shape_cast %13 : vector<32xf32> to vector<32x1xf32>
    %cst_5 = arith.constant 1.280000e+02 : f32
    %15 = vector.broadcast %cst_5 : f32 to vector<32x1xf32>
    %16 = arith.divf %14, %15 : vector<32x1xf32>
    %17 = vector.broadcast %9 : vector<32x1xf32> to vector<32x128xf32>
    %18 = arith.subf %0, %17 : vector<32x128xf32>
    %cst_6 = arith.constant 9.99999974E-6 : f32
    %19 = vector.broadcast %cst_6 : f32 to vector<32x1xf32>
    %20 = arith.addf %16, %19 : vector<32x1xf32>
    %21 = math.rsqrt %20 : vector<32x1xf32>
    %22 = vector.broadcast %21 : vector<32x1xf32> to vector<32x128xf32>
    %23 = arith.mulf %18, %22 : vector<32x128xf32>
    %24 = vector.broadcast %2 : vector<1x128xf32> to vector<32x128xf32>
    %25 = arith.mulf %23, %24 : vector<32x128xf32>
    %26 = vector.broadcast %3 : vector<1x128xf32> to vector<32x128xf32>
    %27 = arith.addf %25, %26 : vector<32x128xf32>
    %28 = arith.truncf %27 : vector<32x128xf32> to vector<32x128xbf16>
    %c0_7 = arith.constant 0 : index
    %c0_8 = arith.constant 0 : index
    %29 = vector.load %arg4[%c0_7, %c0_8] : memref<128x384xbf16, #tpu.memory_space<vmem>>, vector<128x384xbf16>
    %cst_9 = arith.constant dense<0.000000e+00> : vector<32x384xf32>
    %30 = tpu.matmul %28, %29, %cst_9 {dimension_numbers = #tpu.dot_dimension_numbers<[1], [0], [0], [1], [0, 0, 1, 1], [], []>} : vector<32x128xbf16>, vector<128x384xbf16>, vector<32x384xf32> -> vector<32x384xf32>
    %31 = vector.extract_strided_slice %30 {offsets = [0, 0], sizes = [32, 128], strides = [1, 1]} : vector<32x384xf32> to vector<32x128xf32>
    %cst_10 = arith.constant 0.176776692 : f32
    %32 = vector.broadcast %cst_10 : f32 to vector<32x128xf32>
    %33 = arith.mulf %31, %32 : vector<32x128xf32>
    %34 = vector.extract_strided_slice %30 {offsets = [0, 128], sizes = [32, 128], strides = [1, 1]} : vector<32x384xf32> to vector<32x128xf32>
    %35 = vector.extract_strided_slice %30 {offsets = [0, 256], sizes = [32, 128], strides = [1, 1]} : vector<32x384xf32> to vector<32x128xf32>
    %c0_11 = arith.constant 0 : index
    %c0_12 = arith.constant 0 : index
    %36 = vector.load %arg1[%c0_11, %c0_12] : memref<16x128xf32, #tpu.memory_space<vmem>>, vector<16x128xf32>
    %c0_13 = arith.constant 0 : index
    %c0_14 = arith.constant 0 : index
    %37 = vector.load %arg2[%c0_13, %c0_14] : memref<16x128xf32, #tpu.memory_space<vmem>>, vector<16x128xf32>
    %38 = tpu.iota {dimensions = array<i32: 1>} : vector<16x128xi32>
    %c32_i32 = arith.constant 32 : i32
    %c0_i32 = arith.constant 0 : i32
    %39 = arith.cmpi eq, %c32_i32, %c0_i32 : i32
    %c1_i32 = arith.constant 1 : i32
    %40 = arith.select %39, %c1_i32, %c32_i32 : i32
    %41 = vector.broadcast %40 : i32 to vector<16x128xi32>
    %42 = arith.remsi %38, %41 : vector<16x128xi32>
    %c0_i32_15 = arith.constant 0 : i32
    %43 = vector.broadcast %c0_i32_15 : i32 to vector<16x128xi32>
    %44 = arith.cmpi ne, %42, %43 : vector<16x128xi32>
    %c0_i32_16 = arith.constant 0 : i32
    %45 = vector.broadcast %c0_i32_16 : i32 to vector<16x128xi32>
    %46 = arith.cmpi slt, %42, %45 : vector<16x128xi32>
    %c0_i32_17 = arith.constant 0 : i32
    %47 = arith.cmpi slt, %40, %c0_i32_17 : i32
    %48 = vector.broadcast %47 : i1 to vector<16x128xi1>
    %49 = vector.broadcast %48 : vector<16x128xi1> to vector<16x128xi1>
    %50 = arith.xori %46, %49 : vector<16x128xi1>
    %51 = arith.andi %50, %44 : vector<16x128xi1>
    %52 = vector.broadcast %40 : i32 to vector<16x128xi32>
    %53 = arith.addi %42, %52 : vector<16x128xi32>
    %54 = arith.select %51, %53, %42 : vector<16x128xi1>, vector<16x128xi32>
    %c16_i32 = arith.constant 16 : i32
    %55 = vector.broadcast %c16_i32 : i32 to vector<16x128xi32>
    %56 = arith.cmpi slt, %54, %55 : vector<16x128xi32>
    %c0_18 = arith.constant 0 : index
    %c0_19 = arith.constant 0 : index
    %57 = vector.load %arg0[%c0_18, %c0_19] : memref<2x16xf32, #tpu.memory_space<vmem>>, vector<2x16xf32>
    %58 = tpu.iota {dimensions = array<i32: 0>} : vector<16x16xi32>
    %59 = tpu.iota {dimensions = array<i32: 1>} : vector<16x16xi32>
    %60 = arith.cmpi sle, %59, %58 : vector<16x16xi32>
    %61 = vector.extract_strided_slice %33 {offsets = [0, 0], sizes = [16, 128], strides = [1, 1]} : vector<32x128xf32> to vector<16x128xf32>
    %c112_i32 = arith.constant 112 : i32
    %62 = tpu.dynamic_rotate %61 by %c112_i32 dim 1 : vector<16x128xf32>, i32 -> vector<16x128xf32>
    %c16_i32_20 = arith.constant 16 : i32
    %63 = tpu.dynamic_rotate %61 by %c16_i32_20 dim 1 : vector<16x128xf32>, i32 -> vector<16x128xf32>
    %64 = arith.select %56, %62, %63 : vector<16x128xi1>, vector<16x128xf32>
    %65 = arith.mulf %61, %36 : vector<16x128xf32>
    %66 = arith.mulf %64, %37 : vector<16x128xf32>
    %67 = arith.addf %65, %66 : vector<16x128xf32>
    %68 = vector.extract_strided_slice %34 {offsets = [0, 0], sizes = [16, 128], strides = [1, 1]} : vector<32x128xf32> to vector<16x128xf32>
    %c112_i32_21 = arith.constant 112 : i32
    %69 = tpu.dynamic_rotate %68 by %c112_i32_21 dim 1 : vector<16x128xf32>, i32 -> vector<16x128xf32>
    %c16_i32_22 = arith.constant 16 : i32
    %70 = tpu.dynamic_rotate %68 by %c16_i32_22 dim 1 : vector<16x128xf32>, i32 -> vector<16x128xf32>
    %71 = arith.select %56, %69, %70 : vector<16x128xi1>, vector<16x128xf32>
    %72 = arith.mulf %68, %36 : vector<16x128xf32>
    %73 = arith.mulf %71, %37 : vector<16x128xf32>
    %74 = arith.addf %72, %73 : vector<16x128xf32>
    %75 = vector.extract_strided_slice %35 {offsets = [0, 0], sizes = [16, 128], strides = [1, 1]} : vector<32x128xf32> to vector<16x128xf32>
    %76 = arith.truncf %75 : vector<16x128xf32> to vector<16x128xbf16>
    %77 = arith.truncf %67 : vector<16x128xf32> to vector<16x128xbf16>
    %78 = arith.truncf %74 : vector<16x128xf32> to vector<16x128xbf16>
    %79 = vector.extract_strided_slice %57 {offsets = [0, 0], sizes = [1, 16], strides = [1, 1]} : vector<2x16xf32> to vector<1x16xf32>
    %cst_23 = arith.constant 5.000000e-01 : f32
    %80 = vector.broadcast %cst_23 : f32 to vector<1x16xf32>
    %81 = arith.cmpf ogt, %79, %80 : vector<1x16xf32>
    %82 = vector.broadcast %81 : vector<1x16xi1> to vector<16x16xi1>
    %83 = arith.andi %60, %82 : vector<16x16xi1>
    %cst_24 = arith.constant 0.000000e+00 : f32
    %cst_25 = arith.constant -1.000000e+09 : f32
    %84 = vector.broadcast %cst_24 : f32 to vector<16x16xf32>
    %85 = vector.broadcast %cst_25 : f32 to vector<16x16xf32>
    %86 = arith.select %83, %84, %85 : vector<16x16xi1>, vector<16x16xf32>
    %87 = vector.extract_strided_slice %77 {offsets = [0, 0], sizes = [16, 32], strides = [1, 1]} : vector<16x128xbf16> to vector<16x32xbf16>
    %88 = vector.extract_strided_slice %78 {offsets = [0, 0], sizes = [16, 32], strides = [1, 1]} : vector<16x128xbf16> to vector<16x32xbf16>
    %89 = tpu.transpose %88, [1, 0] : vector<16x32xbf16> -> vector<32x16xbf16>
    %cst_26 = arith.constant dense<0.000000e+00> : vector<16x16xf32>
    %90 = tpu.matmul %87, %89, %cst_26 {dimension_numbers = #tpu.dot_dimension_numbers<[1], [0], [0], [1], [0, 0, 1, 1], [], []>} : vector<16x32xbf16>, vector<32x16xbf16>, vector<16x16xf32> -> vector<16x16xf32>
    %91 = arith.addf %90, %86 : vector<16x16xf32>
    %cst_27 = arith.constant dense<0xFF800000> : vector<16xf32>
    %92 = vector.multi_reduction <maximumf>, %91, %cst_27 [1] : vector<16x16xf32> to vector<16xf32>
    %93 = vector.shape_cast %92 : vector<16xf32> to vector<16x1xf32>
    %94 = vector.broadcast %93 : vector<16x1xf32> to vector<16x16xf32>
    %95 = arith.subf %91, %94 : vector<16x16xf32>
    %96 = math.exp %95 : vector<16x16xf32>
    %cst_28 = arith.constant dense<0.000000e+00> : vector<16xf32>
    %97 = vector.multi_reduction <add>, %96, %cst_28 [1] : vector<16x16xf32> to vector<16xf32>
    %98 = vector.shape_cast %97 : vector<16xf32> to vector<16x1xf32>
    %99 = tpu.reciprocal %98 {approx = true} : vector<16x1xf32> -> vector<16x1xf32>
    %100 = vector.broadcast %99 : vector<16x1xf32> to vector<16x16xf32>
    %101 = arith.mulf %96, %100 : vector<16x16xf32>
    %102 = arith.truncf %101 : vector<16x16xf32> to vector<16x16xbf16>
    %103 = vector.extract_strided_slice %76 {offsets = [0, 0], sizes = [16, 32], strides = [1, 1]} : vector<16x128xbf16> to vector<16x32xbf16>
    %cst_29 = arith.constant dense<0.000000e+00> : vector<16x32xf32>
    %104 = tpu.matmul %102, %103, %cst_29 {dimension_numbers = #tpu.dot_dimension_numbers<[1], [0], [0], [1], [0, 0, 1, 1], [], []>} : vector<16x16xbf16>, vector<16x32xbf16>, vector<16x32xf32> -> vector<16x32xf32>
    %105 = vector.extract_strided_slice %77 {offsets = [0, 32], sizes = [16, 32], strides = [1, 1]} : vector<16x128xbf16> to vector<16x32xbf16>
    %106 = vector.extract_strided_slice %78 {offsets = [0, 32], sizes = [16, 32], strides = [1, 1]} : vector<16x128xbf16> to vector<16x32xbf16>
    %107 = tpu.transpose %106, [1, 0] : vector<16x32xbf16> -> vector<32x16xbf16>
    %cst_30 = arith.constant dense<0.000000e+00> : vector<16x16xf32>
    %108 = tpu.matmul %105, %107, %cst_30 {dimension_numbers = #tpu.dot_dimension_numbers<[1], [0], [0], [1], [0, 0, 1, 1], [], []>} : vector<16x32xbf16>, vector<32x16xbf16>, vector<16x16xf32> -> vector<16x16xf32>
    %109 = arith.addf %108, %86 : vector<16x16xf32>
    %cst_31 = arith.constant dense<0xFF800000> : vector<16xf32>
    %110 = vector.multi_reduction <maximumf>, %109, %cst_31 [1] : vector<16x16xf32> to vector<16xf32>
    %111 = vector.shape_cast %110 : vector<16xf32> to vector<16x1xf32>
    %112 = vector.broadcast %111 : vector<16x1xf32> to vector<16x16xf32>
    %113 = arith.subf %109, %112 : vector<16x16xf32>
    %114 = math.exp %113 : vector<16x16xf32>
    %cst_32 = arith.constant dense<0.000000e+00> : vector<16xf32>
    %115 = vector.multi_reduction <add>, %114, %cst_32 [1] : vector<16x16xf32> to vector<16xf32>
    %116 = vector.shape_cast %115 : vector<16xf32> to vector<16x1xf32>
    %117 = tpu.reciprocal %116 {approx = true} : vector<16x1xf32> -> vector<16x1xf32>
    %118 = vector.broadcast %117 : vector<16x1xf32> to vector<16x16xf32>
    %119 = arith.mulf %114, %118 : vector<16x16xf32>
    %120 = arith.truncf %119 : vector<16x16xf32> to vector<16x16xbf16>
    %121 = vector.extract_strided_slice %76 {offsets = [0, 32], sizes = [16, 32], strides = [1, 1]} : vector<16x128xbf16> to vector<16x32xbf16>
    %cst_33 = arith.constant dense<0.000000e+00> : vector<16x32xf32>
    %122 = tpu.matmul %120, %121, %cst_33 {dimension_numbers = #tpu.dot_dimension_numbers<[1], [0], [0], [1], [0, 0, 1, 1], [], []>} : vector<16x16xbf16>, vector<16x32xbf16>, vector<16x32xf32> -> vector<16x32xf32>
    %123 = vector.extract_strided_slice %77 {offsets = [0, 64], sizes = [16, 32], strides = [1, 1]} : vector<16x128xbf16> to vector<16x32xbf16>
    %124 = vector.extract_strided_slice %78 {offsets = [0, 64], sizes = [16, 32], strides = [1, 1]} : vector<16x128xbf16> to vector<16x32xbf16>
    %125 = tpu.transpose %124, [1, 0] : vector<16x32xbf16> -> vector<32x16xbf16>
    %cst_34 = arith.constant dense<0.000000e+00> : vector<16x16xf32>
    %126 = tpu.matmul %123, %125, %cst_34 {dimension_numbers = #tpu.dot_dimension_numbers<[1], [0], [0], [1], [0, 0, 1, 1], [], []>} : vector<16x32xbf16>, vector<32x16xbf16>, vector<16x16xf32> -> vector<16x16xf32>
    %127 = arith.addf %126, %86 : vector<16x16xf32>
    %cst_35 = arith.constant dense<0xFF800000> : vector<16xf32>
    %128 = vector.multi_reduction <maximumf>, %127, %cst_35 [1] : vector<16x16xf32> to vector<16xf32>
    %129 = vector.shape_cast %128 : vector<16xf32> to vector<16x1xf32>
    %130 = vector.broadcast %129 : vector<16x1xf32> to vector<16x16xf32>
    %131 = arith.subf %127, %130 : vector<16x16xf32>
    %132 = math.exp %131 : vector<16x16xf32>
    %cst_36 = arith.constant dense<0.000000e+00> : vector<16xf32>
    %133 = vector.multi_reduction <add>, %132, %cst_36 [1] : vector<16x16xf32> to vector<16xf32>
    %134 = vector.shape_cast %133 : vector<16xf32> to vector<16x1xf32>
    %135 = tpu.reciprocal %134 {approx = true} : vector<16x1xf32> -> vector<16x1xf32>
    %136 = vector.broadcast %135 : vector<16x1xf32> to vector<16x16xf32>
    %137 = arith.mulf %132, %136 : vector<16x16xf32>
    %138 = arith.truncf %137 : vector<16x16xf32> to vector<16x16xbf16>
    %139 = vector.extract_strided_slice %76 {offsets = [0, 64], sizes = [16, 32], strides = [1, 1]} : vector<16x128xbf16> to vector<16x32xbf16>
    %cst_37 = arith.constant dense<0.000000e+00> : vector<16x32xf32>
    %140 = tpu.matmul %138, %139, %cst_37 {dimension_numbers = #tpu.dot_dimension_numbers<[1], [0], [0], [1], [0, 0, 1, 1], [], []>} : vector<16x16xbf16>, vector<16x32xbf16>, vector<16x32xf32> -> vector<16x32xf32>
    %141 = vector.extract_strided_slice %77 {offsets = [0, 96], sizes = [16, 32], strides = [1, 1]} : vector<16x128xbf16> to vector<16x32xbf16>
    %142 = vector.extract_strided_slice %78 {offsets = [0, 96], sizes = [16, 32], strides = [1, 1]} : vector<16x128xbf16> to vector<16x32xbf16>
    %143 = tpu.transpose %142, [1, 0] : vector<16x32xbf16> -> vector<32x16xbf16>
    %cst_38 = arith.constant dense<0.000000e+00> : vector<16x16xf32>
    %144 = tpu.matmul %141, %143, %cst_38 {dimension_numbers = #tpu.dot_dimension_numbers<[1], [0], [0], [1], [0, 0, 1, 1], [], []>} : vector<16x32xbf16>, vector<32x16xbf16>, vector<16x16xf32> -> vector<16x16xf32>
    %145 = arith.addf %144, %86 : vector<16x16xf32>
    %cst_39 = arith.constant dense<0xFF800000> : vector<16xf32>
    %146 = vector.multi_reduction <maximumf>, %145, %cst_39 [1] : vector<16x16xf32> to vector<16xf32>
    %147 = vector.shape_cast %146 : vector<16xf32> to vector<16x1xf32>
    %148 = vector.broadcast %147 : vector<16x1xf32> to vector<16x16xf32>
    %149 = arith.subf %145, %148 : vector<16x16xf32>
    %150 = math.exp %149 : vector<16x16xf32>
    %cst_40 = arith.constant dense<0.000000e+00> : vector<16xf32>
    %151 = vector.multi_reduction <add>, %150, %cst_40 [1] : vector<16x16xf32> to vector<16xf32>
    %152 = vector.shape_cast %151 : vector<16xf32> to vector<16x1xf32>
    %153 = tpu.reciprocal %152 {approx = true} : vector<16x1xf32> -> vector<16x1xf32>
    %154 = vector.broadcast %153 : vector<16x1xf32> to vector<16x16xf32>
    %155 = arith.mulf %150, %154 : vector<16x16xf32>
    %156 = arith.truncf %155 : vector<16x16xf32> to vector<16x16xbf16>
    %157 = vector.extract_strided_slice %76 {offsets = [0, 96], sizes = [16, 32], strides = [1, 1]} : vector<16x128xbf16> to vector<16x32xbf16>
    %cst_41 = arith.constant dense<0.000000e+00> : vector<16x32xf32>
    %158 = tpu.matmul %156, %157, %cst_41 {dimension_numbers = #tpu.dot_dimension_numbers<[1], [0], [0], [1], [0, 0, 1, 1], [], []>} : vector<16x16xbf16>, vector<16x32xbf16>, vector<16x32xf32> -> vector<16x32xf32>
    %159 = tpu.concatenate %104, %122, %140, %158 in 1 : vector<16x32xf32>, vector<16x32xf32>, vector<16x32xf32>, vector<16x32xf32> -> vector<16x128xf32>
    %160 = vector.extract_strided_slice %33 {offsets = [16, 0], sizes = [16, 128], strides = [1, 1]} : vector<32x128xf32> to vector<16x128xf32>
    %c112_i32_42 = arith.constant 112 : i32
    %161 = tpu.dynamic_rotate %160 by %c112_i32_42 dim 1 : vector<16x128xf32>, i32 -> vector<16x128xf32>
    %c16_i32_43 = arith.constant 16 : i32
    %162 = tpu.dynamic_rotate %160 by %c16_i32_43 dim 1 : vector<16x128xf32>, i32 -> vector<16x128xf32>
    %163 = arith.select %56, %161, %162 : vector<16x128xi1>, vector<16x128xf32>
    %164 = arith.mulf %160, %36 : vector<16x128xf32>
    %165 = arith.mulf %163, %37 : vector<16x128xf32>
    %166 = arith.addf %164, %165 : vector<16x128xf32>
    %167 = vector.extract_strided_slice %34 {offsets = [16, 0], sizes = [16, 128], strides = [1, 1]} : vector<32x128xf32> to vector<16x128xf32>
    %c112_i32_44 = arith.constant 112 : i32
    %168 = tpu.dynamic_rotate %167 by %c112_i32_44 dim 1 : vector<16x128xf32>, i32 -> vector<16x128xf32>
    %c16_i32_45 = arith.constant 16 : i32
    %169 = tpu.dynamic_rotate %167 by %c16_i32_45 dim 1 : vector<16x128xf32>, i32 -> vector<16x128xf32>
    %170 = arith.select %56, %168, %169 : vector<16x128xi1>, vector<16x128xf32>
    %171 = arith.mulf %167, %36 : vector<16x128xf32>
    %172 = arith.mulf %170, %37 : vector<16x128xf32>
    %173 = arith.addf %171, %172 : vector<16x128xf32>
    %174 = vector.extract_strided_slice %35 {offsets = [16, 0], sizes = [16, 128], strides = [1, 1]} : vector<32x128xf32> to vector<16x128xf32>
    %175 = arith.truncf %174 : vector<16x128xf32> to vector<16x128xbf16>
    %176 = arith.truncf %166 : vector<16x128xf32> to vector<16x128xbf16>
    %177 = arith.truncf %173 : vector<16x128xf32> to vector<16x128xbf16>
    %178 = vector.extract_strided_slice %57 {offsets = [1, 0], sizes = [1, 16], strides = [1, 1]} : vector<2x16xf32> to vector<1x16xf32>
    %cst_46 = arith.constant 5.000000e-01 : f32
    %179 = vector.broadcast %cst_46 : f32 to vector<1x16xf32>
    %180 = arith.cmpf ogt, %178, %179 : vector<1x16xf32>
    %181 = vector.broadcast %180 : vector<1x16xi1> to vector<16x16xi1>
    %182 = arith.andi %60, %181 : vector<16x16xi1>
    %cst_47 = arith.constant 0.000000e+00 : f32
    %cst_48 = arith.constant -1.000000e+09 : f32
    %183 = vector.broadcast %cst_47 : f32 to vector<16x16xf32>
    %184 = vector.broadcast %cst_48 : f32 to vector<16x16xf32>
    %185 = arith.select %182, %183, %184 : vector<16x16xi1>, vector<16x16xf32>
    %186 = vector.extract_strided_slice %176 {offsets = [0, 0], sizes = [16, 32], strides = [1, 1]} : vector<16x128xbf16> to vector<16x32xbf16>
    %187 = vector.extract_strided_slice %177 {offsets = [0, 0], sizes = [16, 32], strides = [1, 1]} : vector<16x128xbf16> to vector<16x32xbf16>
    %188 = tpu.transpose %187, [1, 0] : vector<16x32xbf16> -> vector<32x16xbf16>
    %cst_49 = arith.constant dense<0.000000e+00> : vector<16x16xf32>
    %189 = tpu.matmul %186, %188, %cst_49 {dimension_numbers = #tpu.dot_dimension_numbers<[1], [0], [0], [1], [0, 0, 1, 1], [], []>} : vector<16x32xbf16>, vector<32x16xbf16>, vector<16x16xf32> -> vector<16x16xf32>
    %190 = arith.addf %189, %185 : vector<16x16xf32>
    %cst_50 = arith.constant dense<0xFF800000> : vector<16xf32>
    %191 = vector.multi_reduction <maximumf>, %190, %cst_50 [1] : vector<16x16xf32> to vector<16xf32>
    %192 = vector.shape_cast %191 : vector<16xf32> to vector<16x1xf32>
    %193 = vector.broadcast %192 : vector<16x1xf32> to vector<16x16xf32>
    %194 = arith.subf %190, %193 : vector<16x16xf32>
    %195 = math.exp %194 : vector<16x16xf32>
    %cst_51 = arith.constant dense<0.000000e+00> : vector<16xf32>
    %196 = vector.multi_reduction <add>, %195, %cst_51 [1] : vector<16x16xf32> to vector<16xf32>
    %197 = vector.shape_cast %196 : vector<16xf32> to vector<16x1xf32>
    %198 = tpu.reciprocal %197 {approx = true} : vector<16x1xf32> -> vector<16x1xf32>
    %199 = vector.broadcast %198 : vector<16x1xf32> to vector<16x16xf32>
    %200 = arith.mulf %195, %199 : vector<16x16xf32>
    %201 = arith.truncf %200 : vector<16x16xf32> to vector<16x16xbf16>
    %202 = vector.extract_strided_slice %175 {offsets = [0, 0], sizes = [16, 32], strides = [1, 1]} : vector<16x128xbf16> to vector<16x32xbf16>
    %cst_52 = arith.constant dense<0.000000e+00> : vector<16x32xf32>
    %203 = tpu.matmul %201, %202, %cst_52 {dimension_numbers = #tpu.dot_dimension_numbers<[1], [0], [0], [1], [0, 0, 1, 1], [], []>} : vector<16x16xbf16>, vector<16x32xbf16>, vector<16x32xf32> -> vector<16x32xf32>
    %204 = vector.extract_strided_slice %176 {offsets = [0, 32], sizes = [16, 32], strides = [1, 1]} : vector<16x128xbf16> to vector<16x32xbf16>
    %205 = vector.extract_strided_slice %177 {offsets = [0, 32], sizes = [16, 32], strides = [1, 1]} : vector<16x128xbf16> to vector<16x32xbf16>
    %206 = tpu.transpose %205, [1, 0] : vector<16x32xbf16> -> vector<32x16xbf16>
    %cst_53 = arith.constant dense<0.000000e+00> : vector<16x16xf32>
    %207 = tpu.matmul %204, %206, %cst_53 {dimension_numbers = #tpu.dot_dimension_numbers<[1], [0], [0], [1], [0, 0, 1, 1], [], []>} : vector<16x32xbf16>, vector<32x16xbf16>, vector<16x16xf32> -> vector<16x16xf32>
    %208 = arith.addf %207, %185 : vector<16x16xf32>
    %cst_54 = arith.constant dense<0xFF800000> : vector<16xf32>
    %209 = vector.multi_reduction <maximumf>, %208, %cst_54 [1] : vector<16x16xf32> to vector<16xf32>
    %210 = vector.shape_cast %209 : vector<16xf32> to vector<16x1xf32>
    %211 = vector.broadcast %210 : vector<16x1xf32> to vector<16x16xf32>
    %212 = arith.subf %208, %211 : vector<16x16xf32>
    %213 = math.exp %212 : vector<16x16xf32>
    %cst_55 = arith.constant dense<0.000000e+00> : vector<16xf32>
    %214 = vector.multi_reduction <add>, %213, %cst_55 [1] : vector<16x16xf32> to vector<16xf32>
    %215 = vector.shape_cast %214 : vector<16xf32> to vector<16x1xf32>
    %216 = tpu.reciprocal %215 {approx = true} : vector<16x1xf32> -> vector<16x1xf32>
    %217 = vector.broadcast %216 : vector<16x1xf32> to vector<16x16xf32>
    %218 = arith.mulf %213, %217 : vector<16x16xf32>
    %219 = arith.truncf %218 : vector<16x16xf32> to vector<16x16xbf16>
    %220 = vector.extract_strided_slice %175 {offsets = [0, 32], sizes = [16, 32], strides = [1, 1]} : vector<16x128xbf16> to vector<16x32xbf16>
    %cst_56 = arith.constant dense<0.000000e+00> : vector<16x32xf32>
    %221 = tpu.matmul %219, %220, %cst_56 {dimension_numbers = #tpu.dot_dimension_numbers<[1], [0], [0], [1], [0, 0, 1, 1], [], []>} : vector<16x16xbf16>, vector<16x32xbf16>, vector<16x32xf32> -> vector<16x32xf32>
    %222 = vector.extract_strided_slice %176 {offsets = [0, 64], sizes = [16, 32], strides = [1, 1]} : vector<16x128xbf16> to vector<16x32xbf16>
    %223 = vector.extract_strided_slice %177 {offsets = [0, 64], sizes = [16, 32], strides = [1, 1]} : vector<16x128xbf16> to vector<16x32xbf16>
    %224 = tpu.transpose %223, [1, 0] : vector<16x32xbf16> -> vector<32x16xbf16>
    %cst_57 = arith.constant dense<0.000000e+00> : vector<16x16xf32>
    %225 = tpu.matmul %222, %224, %cst_57 {dimension_numbers = #tpu.dot_dimension_numbers<[1], [0], [0], [1], [0, 0, 1, 1], [], []>} : vector<16x32xbf16>, vector<32x16xbf16>, vector<16x16xf32> -> vector<16x16xf32>
    %226 = arith.addf %225, %185 : vector<16x16xf32>
    %cst_58 = arith.constant dense<0xFF800000> : vector<16xf32>
    %227 = vector.multi_reduction <maximumf>, %226, %cst_58 [1] : vector<16x16xf32> to vector<16xf32>
    %228 = vector.shape_cast %227 : vector<16xf32> to vector<16x1xf32>
    %229 = vector.broadcast %228 : vector<16x1xf32> to vector<16x16xf32>
    %230 = arith.subf %226, %229 : vector<16x16xf32>
    %231 = math.exp %230 : vector<16x16xf32>
    %cst_59 = arith.constant dense<0.000000e+00> : vector<16xf32>
    %232 = vector.multi_reduction <add>, %231, %cst_59 [1] : vector<16x16xf32> to vector<16xf32>
    %233 = vector.shape_cast %232 : vector<16xf32> to vector<16x1xf32>
    %234 = tpu.reciprocal %233 {approx = true} : vector<16x1xf32> -> vector<16x1xf32>
    %235 = vector.broadcast %234 : vector<16x1xf32> to vector<16x16xf32>
    %236 = arith.mulf %231, %235 : vector<16x16xf32>
    %237 = arith.truncf %236 : vector<16x16xf32> to vector<16x16xbf16>
    %238 = vector.extract_strided_slice %175 {offsets = [0, 64], sizes = [16, 32], strides = [1, 1]} : vector<16x128xbf16> to vector<16x32xbf16>
    %cst_60 = arith.constant dense<0.000000e+00> : vector<16x32xf32>
    %239 = tpu.matmul %237, %238, %cst_60 {dimension_numbers = #tpu.dot_dimension_numbers<[1], [0], [0], [1], [0, 0, 1, 1], [], []>} : vector<16x16xbf16>, vector<16x32xbf16>, vector<16x32xf32> -> vector<16x32xf32>
    %240 = vector.extract_strided_slice %176 {offsets = [0, 96], sizes = [16, 32], strides = [1, 1]} : vector<16x128xbf16> to vector<16x32xbf16>
    %241 = vector.extract_strided_slice %177 {offsets = [0, 96], sizes = [16, 32], strides = [1, 1]} : vector<16x128xbf16> to vector<16x32xbf16>
    %242 = tpu.transpose %241, [1, 0] : vector<16x32xbf16> -> vector<32x16xbf16>
    %cst_61 = arith.constant dense<0.000000e+00> : vector<16x16xf32>
    %243 = tpu.matmul %240, %242, %cst_61 {dimension_numbers = #tpu.dot_dimension_numbers<[1], [0], [0], [1], [0, 0, 1, 1], [], []>} : vector<16x32xbf16>, vector<32x16xbf16>, vector<16x16xf32> -> vector<16x16xf32>
    %244 = arith.addf %243, %185 : vector<16x16xf32>
    %cst_62 = arith.constant dense<0xFF800000> : vector<16xf32>
    %245 = vector.multi_reduction <maximumf>, %244, %cst_62 [1] : vector<16x16xf32> to vector<16xf32>
    %246 = vector.shape_cast %245 : vector<16xf32> to vector<16x1xf32>
    %247 = vector.broadcast %246 : vector<16x1xf32> to vector<16x16xf32>
    %248 = arith.subf %244, %247 : vector<16x16xf32>
    %249 = math.exp %248 : vector<16x16xf32>
    %cst_63 = arith.constant dense<0.000000e+00> : vector<16xf32>
    %250 = vector.multi_reduction <add>, %249, %cst_63 [1] : vector<16x16xf32> to vector<16xf32>
    %251 = vector.shape_cast %250 : vector<16xf32> to vector<16x1xf32>
    %252 = tpu.reciprocal %251 {approx = true} : vector<16x1xf32> -> vector<16x1xf32>
    %253 = vector.broadcast %252 : vector<16x1xf32> to vector<16x16xf32>
    %254 = arith.mulf %249, %253 : vector<16x16xf32>
    %255 = arith.truncf %254 : vector<16x16xf32> to vector<16x16xbf16>
    %256 = vector.extract_strided_slice %175 {offsets = [0, 96], sizes = [16, 32], strides = [1, 1]} : vector<16x128xbf16> to vector<16x32xbf16>
    %cst_64 = arith.constant dense<0.000000e+00> : vector<16x32xf32>
    %257 = tpu.matmul %255, %256, %cst_64 {dimension_numbers = #tpu.dot_dimension_numbers<[1], [0], [0], [1], [0, 0, 1, 1], [], []>} : vector<16x16xbf16>, vector<16x32xbf16>, vector<16x32xf32> -> vector<16x32xf32>
    %258 = tpu.concatenate %203, %221, %239, %257 in 1 : vector<16x32xf32>, vector<16x32xf32>, vector<16x32xf32>, vector<16x32xf32> -> vector<16x128xf32>
    %259 = tpu.concatenate %159, %258 in 0 : vector<16x128xf32>, vector<16x128xf32> -> vector<32x128xf32>
    %260 = arith.truncf %259 : vector<32x128xf32> to vector<32x128xbf16>
    %c0_65 = arith.constant 0 : index
    %c0_66 = arith.constant 0 : index
    %261 = vector.load %arg5[%c0_65, %c0_66] : memref<128x128xbf16, #tpu.memory_space<vmem>>, vector<128x128xbf16>
    %cst_67 = arith.constant dense<0.000000e+00> : vector<32x128xf32>
    %262 = tpu.matmul %260, %261, %cst_67 {dimension_numbers = #tpu.dot_dimension_numbers<[1], [0], [0], [1], [0, 0, 1, 1], [], []>} : vector<32x128xbf16>, vector<128x128xbf16>, vector<32x128xf32> -> vector<32x128xf32>
    %263 = arith.addf %0, %262 : vector<32x128xf32>
    %cst_68 = arith.constant dense<0.000000e+00> : vector<32xf32>
    %264 = vector.multi_reduction <add>, %263, %cst_68 [1] : vector<32x128xf32> to vector<32xf32>
    %265 = vector.shape_cast %264 : vector<32xf32> to vector<32x1xf32>
    %cst_69 = arith.constant 1.280000e+02 : f32
    %266 = vector.broadcast %cst_69 : f32 to vector<32x1xf32>
    %267 = arith.divf %265, %266 : vector<32x1xf32>
    %268 = vector.broadcast %267 : vector<32x1xf32> to vector<32x128xf32>
    %269 = arith.subf %263, %268 : vector<32x128xf32>
    %270 = arith.mulf %269, %269 : vector<32x128xf32>
    %cst_70 = arith.constant dense<0.000000e+00> : vector<32xf32>
    %271 = vector.multi_reduction <add>, %270, %cst_70 [1] : vector<32x128xf32> to vector<32xf32>
    %272 = vector.shape_cast %271 : vector<32xf32> to vector<32x1xf32>
    %cst_71 = arith.constant 1.280000e+02 : f32
    %273 = vector.broadcast %cst_71 : f32 to vector<32x1xf32>
    %274 = arith.divf %272, %273 : vector<32x1xf32>
    %275 = vector.broadcast %267 : vector<32x1xf32> to vector<32x128xf32>
    %276 = arith.subf %263, %275 : vector<32x128xf32>
    %cst_72 = arith.constant 9.99999974E-6 : f32
    %277 = vector.broadcast %cst_72 : f32 to vector<32x1xf32>
    %278 = arith.addf %274, %277 : vector<32x1xf32>
    %279 = math.rsqrt %278 : vector<32x1xf32>
    %280 = vector.broadcast %279 : vector<32x1xf32> to vector<32x128xf32>
    %281 = arith.mulf %276, %280 : vector<32x128xf32>
    %282 = vector.broadcast %4 : vector<1x128xf32> to vector<32x128xf32>
    %283 = arith.mulf %281, %282 : vector<32x128xf32>
    %284 = vector.broadcast %5 : vector<1x128xf32> to vector<32x128xf32>
    %285 = arith.addf %283, %284 : vector<32x128xf32>
    %286 = arith.truncf %285 : vector<32x128xf32> to vector<32x128xbf16>
    %c0_73 = arith.constant 0 : index
    %c0_74 = arith.constant 0 : index
    %287 = vector.load %arg7[%c0_73, %c0_74] : memref<128x512xbf16, #tpu.memory_space<vmem>>, vector<128x512xbf16>
    %cst_75 = arith.constant dense<0.000000e+00> : vector<32x512xf32>
    %288 = tpu.matmul %286, %287, %cst_75 {dimension_numbers = #tpu.dot_dimension_numbers<[1], [0], [0], [1], [0, 0, 1, 1], [], []>} : vector<32x128xbf16>, vector<128x512xbf16>, vector<32x512xf32> -> vector<32x512xf32>
    %289 = vector.extract_strided_slice %288 {offsets = [0, 0], sizes = [32, 256], strides = [1, 1]} : vector<32x512xf32> to vector<32x256xf32>
    %290 = vector.extract_strided_slice %288 {offsets = [0, 256], sizes = [32, 256], strides = [1, 1]} : vector<32x512xf32> to vector<32x256xf32>
    %291 = arith.negf %289 : vector<32x256xf32>
    %292 = math.exp %291 : vector<32x256xf32>
    %cst_76 = arith.constant 1.000000e+00 : f32
    %293 = vector.broadcast %cst_76 : f32 to vector<32x256xf32>
    %294 = arith.addf %293, %292 : vector<32x256xf32>
    %295 = arith.divf %293, %294 : vector<32x256xf32>
    %296 = arith.mulf %289, %295 : vector<32x256xf32>
    %297 = arith.mulf %296, %290 : vector<32x256xf32>
    %298 = arith.truncf %297 : vector<32x256xf32> to vector<32x256xbf16>
    %c0_77 = arith.constant 0 : index
    %c0_78 = arith.constant 0 : index
    %299 = vector.load %arg8[%c0_77, %c0_78] : memref<256x128xbf16, #tpu.memory_space<vmem>>, vector<256x128xbf16>
    %cst_79 = arith.constant dense<0.000000e+00> : vector<32x128xf32>
    %300 = tpu.matmul %298, %299, %cst_79 {dimension_numbers = #tpu.dot_dimension_numbers<[1], [0], [0], [1], [0, 0, 1, 1], [], []>} : vector<32x256xbf16>, vector<256x128xbf16>, vector<32x128xf32> -> vector<32x128xf32>
    %301 = arith.addf %300, %263 : vector<32x128xf32>
    %c0_80 = arith.constant 0 : index
    %c0_81 = arith.constant 0 : index
    %302 = vector.load %arg9[%c0_80, %c0_81] : memref<32x128xf32, #tpu.memory_space<vmem>>, vector<32x128xf32>
    tpu.vector_store %arg9[%c0_80, %c0_81], %301 {strides = array<i32>} : memref<32x128xf32, #tpu.memory_space<vmem>>, vector<32x128xf32>,
    return
  }
}

</mosaic_0001>

<bundles_post_ra>
// kernel: transformer_block.1
= control target key start
LH: loop header
LB: loop body
LE: loop exit
PB: predicated region body
PF: predicated region fallthrough
CT: control target
= control target key end

     0   :  { %14 = vsyncpa [#allocation3], 0  ;;  %s3681_s0 = inlined_call_operand.vmem [shape: f32[2,16], index: 0, kind: input, shape index: {}]   ;;  %s3682_s1 = inlined_call_operand.hbm [shape: f32[16,128], index: 1, kind: input, shape index: {}]   ;;  %s3683_s2 = inlined_call_operand.hbm [shape: f32[16,128], index: 2, kind: input, shape index: {}]   ;;  %s3684_s3 = inlined_call_operand.hbm [shape: f32[32,128], index: 3, kind: input, shape index: {}]   ;;  %s3685_s4 = inlined_call_operand.hbm [shape: bf16[128,384], index: 4, kind: input, shape index: {}]   ;;  %s3686_s5 = inlined_call_operand.hbm [shape: bf16[128,128], index: 5, kind: input, shape index: {}]   ;;  %s3687_s6 = inlined_call_operand.vmem [shape: f32[4,128], index: 6, kind: input, shape index: {}]   ;;  %s3688_s7 = inlined_call_operand.hbm [shape: bf16[128,512], index: 7, kind: input, shape index: {}]   ;;  %s3689_s8 = inlined_call_operand.hbm [shape: bf16[256,128], index: 8, kind: input, shape index: {}]   ;;  %s3690_s9 = inlined_call_operand.hbm [shape: f32[32,128], index: 9, kind: output, shape index: {}]  }
   0x1   :  { %15 = vsyncpa [#allocation6], 0 }
   0x2   :  { %16 = vsyncpa [#allocation9], 0 }
   0x3   :  { %17 = vsyncpa [#allocation12], 0 }
   0x4   :  { %18 = vsyncpa [#allocation4], 0  ;;  %s3114_s30 = smov [#allocation5]   ;;  %s3115_s11 = smov [#allocation8]  }
   0x5   :  { %s38_s10 = sshll.u32 %s3114_s30, 4  ;;  %s62_s12 = sshll.u32 %s3115_s11, 4  ;;  %s39_s10 = int_to_ptr.vmem [resolvable:$true] %s38_s10  ;;  %s63_s12 = int_to_ptr.vmem [resolvable:$true] %s62_s12 }
   0x6   :  { %s2952_s13 = scalar_lea.vmem %s39_s10, 256  ;;  %p2957_p1 = scmp.lt.s32.totalorder %s39_s10, %s39_s10 }
   0x7   :  { %p2953_p0 = scmp.ne.s32.totalorder %s39_s10, %s2952_s13  ;;  %p2958_p2 = scmp.lt.s32.totalorder %s2952_s13, %s2952_s13 }
   0x9   :  { %p2959_p3 = por %p2958_p2, %p2957_p1 }
   0xb   :  { %p2960_p4 = pnand %p2959_p3, %p2953_p0 }
   0xd   :  { %2963 = shalt.err (!%p2960_p4)
}
   0xe   :  { %s3116_s14 = smov 128   ;;  %s3117_s15 = smov 8  }
   0xf   :  { %44 = dma.hbm_to_vmem [thread:$0]  %s3683_s2, 256, %s39_s10, [#allocation6], %s3116_s14, %s3116_s14, %s3117_s15  }
  0x10   :  { %s2972_s18 = scalar_lea.vmem %s63_s12, 3072  ;;  %p2977_p6 = scmp.lt.s32.totalorder %s63_s12, %s63_s12 }
  0x11   :  { %p2973_p5 = scmp.ne.s32.totalorder %s63_s12, %s2972_s18  ;;  %p2978_p7 = scmp.lt.s32.totalorder %s2972_s18, %s2972_s18 }
  0x13   :  { %p2979_p8 = por %p2978_p7, %p2977_p6 }
  0x15   :  { %p2980_p9 = pnand %p2979_p8, %p2973_p5 }
  0x17   :  { %2983 = shalt.err (!%p2980_p9)
}
  0x18   :  { %s3118_s19 = smov 192   ;;  %s3119_s20 = smov 12  }
  0x19   :  { %68 = dma.hbm_to_vmem [thread:$0]  %s3685_s4, 3072, %s63_s12, [#allocation9], %s3118_s19, %s3118_s19, %s3119_s20  }
  0x1a   :  { %s3120_s23 = smov [#allocation11]  }
  0x1b   :  { %s88_s24 = sshll.u32 %s3120_s23, 4  ;;  %s89_s24 = int_to_ptr.vmem [resolvable:$true] %s88_s24 }
  0x1c   :  { %s2992_s25 = scalar_lea.vmem %s89_s24, 4096  ;;  %p2997_p11 = scmp.lt.s32.totalorder %s89_s24, %s89_s24 }
  0x1d   :  { %p2993_p10 = scmp.ne.s32.totalorder %s89_s24, %s2992_s25  ;;  %p2998_p12 = scmp.lt.s32.totalorder %s2992_s25, %s2992_s25 }
  0x1f   :  { %p2999_p13 = por %p2998_p12, %p2997_p11 }
  0x21   :  { %p3000_p0 = pnand %p2999_p13, %p2993_p10 }
  0x23   :  { %3003 = shalt.err (!%p3000_p0)
}
  0x24   :  { %s3121_s2 = smov 256   ;;  %s3122_s26 = smov 16  }
  0x25   :  { %94 = dma.hbm_to_vmem [thread:$0]  %s3688_s7, 4096, %s89_s24, [#allocation12], %s3121_s2, %s3121_s2, %s3122_s26  }
  0x26   :  { %s3123_s29 = smov [#allocation2]   ;;  %s3124_s4 = smov [#allocation7]  }
  0x27   :  { %s26_s30 = sshll.u32 %s3123_s29, 4  ;;  %s50_s10 = sshll.u32 %s3124_s4, 4  ;;  %s27_s30 = int_to_ptr.vmem [resolvable:$true] %s26_s30  ;;  %s51_s10 = int_to_ptr.vmem [resolvable:$true] %s50_s10 }
  0x28   :  { %s3012_s11 = scalar_lea.vmem %s27_s30, 256  ;;  %p3017_p2 = scmp.lt.s32.totalorder %s27_s30, %s27_s30 }
  0x29   :  { %p3013_p1 = scmp.ne.s32.totalorder %s27_s30, %s3012_s11  ;;  %p3018_p3 = scmp.lt.s32.totalorder %s3012_s11, %s3012_s11 }
  0x2b   :  { %p3019_p4 = por %p3018_p3, %p3017_p2 }
  0x2d   :  { %p3020_p5 = pnand %p3019_p4, %p3013_p1 }
  0x2f   :  { %3023 = shalt.err (!%p3020_p5)
}
  0x30   :  { %32 = dma.hbm_to_vmem [thread:$0]  %s3682_s1, 256, %s27_s30, [#allocation3], %s3116_s14, %s3116_s14, %s3117_s15  }
  0x31   :  { %s3032_s7 = scalar_lea.vmem %s51_s10, 512  ;;  %p3037_p7 = scmp.lt.s32.totalorder %s51_s10, %s51_s10 }
  0x32   :  { %p3033_p6 = scmp.ne.s32.totalorder %s51_s10, %s3032_s7  ;;  %p3038_p8 = scmp.lt.s32.totalorder %s3032_s7, %s3032_s7 }
  0x34   :  { %p3039_p9 = por %p3038_p8, %p3037_p7 }
  0x36   :  { %p3040_p10 = pnand %p3039_p9, %p3033_p6 }
  0x38   :  { %3043 = shalt.err (!%p3040_p10)
}
  0x39   :  { %56 = dma.hbm_to_vmem [thread:$0]  %s3684_s3, 512, %s51_s10, [#allocation6], %s3116_s14, %s3116_s14, %s3117_s15  }
  0x3a   :  { %s3125_s18 = smov [#allocation10]  }
  0x3b   :  { %s74_s19 = sshll.u32 %s3125_s18, 4  ;;  %s75_s19 = int_to_ptr.vmem [resolvable:$true] %s74_s19 }
  0x3c   :  { %s3052_s20 = scalar_lea.vmem %s75_s19, 1024  ;;  %p3057_p12 = scmp.lt.s32.totalorder %s75_s19, %s75_s19 }
  0x3d   :  { %p3053_p11 = scmp.ne.s32.totalorder %s75_s19, %s3052_s20  ;;  %p3058_p13 = scmp.lt.s32.totalorder %s3052_s20, %s3052_s20 }
  0x3f   :  { %p3059_p0 = por %p3058_p13, %p3057_p12 }
  0x41   :  { %p3060_p1 = pnand %p3059_p0, %p3053_p11 }
  0x43   :  { %3063 = shalt.err (!%p3060_p1)
}
  0x44   :  { %s3126_s1 = smov 64   ;;  %s3127_s21 = smov 4  }
  0x45   :  { %80 = dma.hbm_to_vmem [thread:$0]  %s3686_s5, 1024, %s75_s19, [#allocation9], %s3126_s1, %s3126_s1, %s3127_s21  }
  0x46   :  { %s3128_s24 = smov [#allocation13]  }
  0x47   :  { %s100_s3 = sshll.u32 %s3128_s24, 4  ;;  %s101_s3 = int_to_ptr.vmem [resolvable:$true] %s100_s3 }
  0x48   :  { %s3072_s25 = scalar_lea.vmem %s101_s3, 2048  ;;  %p3077_p3 = scmp.lt.s32.totalorder %s101_s3, %s101_s3 }
  0x49   :  { %p3073_p2 = scmp.ne.s32.totalorder %s101_s3, %s3072_s25  ;;  %p3078_p4 = scmp.lt.s32.totalorder %s3072_s25, %s3072_s25 }
  0x4b   :  { %p3079_p5 = por %p3078_p4, %p3077_p3 }
  0x4d   :  { %p3080_p6 = pnand %p3079_p5, %p3073_p2 }
  0x4f   :  { %3083 = shalt.err (!%p3080_p6)
}
  0x50   :  { %106 = dma.hbm_to_vmem [thread:$0]  %s3689_s8, 2048, %s101_s3, [#allocation12], %s3126_s1, %s3126_s1, %s3127_s21  }
  0x51   :  { %3104 = dma.done.wait [#allocation3], 256  }
  0x52   :  { %3105 = vsyncadd [#allocation3], 4294967040 }
  0x53   :  { %3106 = dma.done.wait [#allocation6], 768  }
  0x54   :  { %3107 = vsyncadd [#allocation6], 4294966528 }
  0x55   :  { %3108 = dma.done.wait [#allocation9], 4096  }
  0x56   :  { %3109 = vsyncadd [#allocation9], 4294963200 }
  0x57   :  { %3110 = dma.done.wait [#allocation12], 6144  }
  0x58   :  { %3111 = vsyncadd [#allocation12], 4294961152  ;;  %v129_v0 = vld [vmem:[#allocation7] sm:$0xff]  ;;  %v131_v1 = vld [vmem:[#allocation7 + $0x10] sm:$0xff]  ;;  %v3129_v39 = vmov 0   ;;  %v179_v54 = vlaneseq  ;;  %s3131_s28 = smov 112  }
  0x59   :  { %v130_v2 = vld [vmem:[#allocation7 + $0x8] sm:$0xff]  ;;  %134 = vadd.xlane.f32.xlu0 %v129_v0  ;;  %138 = vadd.xlane.f32.xlu1 %v131_v1  ;;  %v132_v3 = vld [vmem:[#allocation7 + $0x18] sm:$0xff]  ;;  %v2726_v22 = vld [vmem:[#allocation8 + $0x94] ss:$12 sps:$4 sm:$0xff]   ;;  %vm3132_vm0 = vmmov 0   ;;  %vm534_vm2 = vcmask 261120  }
  0x5a   :  { %v2723_v4 = vld [vmem:[#allocation8 + $0xac] ss:$12 sps:$4 sm:$0xff]   ;;  %v2725_v5 = vld [vmem:[#allocation8 + $0xa8] ss:$12 sps:$4 sm:$0xff]   ;;  %v2728_v23 = vld [vmem:[#allocation8 + $0xb0] ss:$12 sps:$4 sm:$0xff]   ;;  %389 = vmatprep.mubr.bf16.mxu0 %v3129_v39 }
  0x5b   :  { %357 = vmatprep.subr.bf16.mxu0 %v2723_v4  ;;  %v2729_v24 = vld [vmem:[#allocation8 + $0x90] ss:$12 sps:$4 sm:$0xff]   ;;  %2534 = vmatprep.subr.bf16.mxu1 %v2728_v23  ;;  %v2732_v26 = vld [vmem:[#allocation8 + $0x98] ss:$12 sps:$4 sm:$0xff]   ;;  %v2736_v29 = vld [vmem:[#allocation8 + $0x80] ss:$12 sps:$4 sm:$0xff]  }
  0x5c   :  { %358 = vmatpush1.bf16.msra.mxu0 %v2725_v5  ;;  %2535 = vmatpush3.bf16.msra.mxu1 %v2728_v23  ;;  %v2730_v25 = vld [vmem:[#allocation8 + $0x7c] ss:$12 sps:$4 sm:$0xff]   ;;  %v2733_v27 = vld [vmem:[#allocation8 + $0x78] ss:$12 sps:$4 sm:$0xff]   ;;  %v2737_v30 = vld [vmem:[#allocation8 + $0x60] ss:$12 sps:$4 sm:$0xff]  }
  0x5d   :  { %136 = vadd.xlane.f32.xlu0 %v130_v2  ;;  %140 = vadd.xlane.f32.xlu1 %v132_v3  ;;  %v2734_v28 = vld [vmem:[#allocation8 + $0x64] ss:$12 sps:$4 sm:$0xff]   ;;  %v2738_v31 = vld [vmem:[#allocation8 + $0x4c] ss:$12 sps:$4 sm:$0xff]   ;;  %v2740_v32 = vld [vmem:[#allocation8 + $0x68] ss:$12 sps:$4 sm:$0xff]  }
  0x5e   :  { %359 = vmatprep.subr.bf16.mxu0 %v2726_v22  ;;  %2536 = vmatprep.subr.bf16.mxu1 %v2732_v26  ;;  %v2741_v33 = vld [vmem:[#allocation8 + $0x48] ss:$12 sps:$4 sm:$0xff]   ;;  %v2744_v35 = vld [vmem:[#allocation8 + $0x50] ss:$12 sps:$4 sm:$0xff]   ;;  %v2748_v38 = vld [vmem:[#allocation8 + $0x38] ss:$12 sps:$4 sm:$0xff]  }
  0x5f   :  { %v2742_v34 = vld [vmem:[#allocation8 + $0x34] ss:$12 sps:$4 sm:$0xff]   ;;  %v2745_v36 = vld [vmem:[#allocation8 + $0x30] ss:$12 sps:$4 sm:$0xff]   ;;  %v2749_v40 = vld [vmem:[#allocation8 + $0x18] ss:$12 sps:$4 sm:$0xff]  }
  0x60   :  { %360 = vmatpush1.bf16.msra.mxu0 %v2729_v24  ;;  %2537 = vmatpush3.bf16.msra.mxu1 %v2732_v26  ;;  %v2746_v37 = vld [vmem:[#allocation8 + $0x1c] ss:$12 sps:$4 sm:$0xff]   ;;  %v2750_v41 = vld [vmem:[#allocation8 + $0x4] ss:$12 sps:$4 sm:$0xff]   ;;  %v2752_v42 = vld [vmem:[#allocation8 + $0x20] ss:$12 sps:$4 sm:$0xff]  }
  0x61   :  { %361 = vmatprep.subr.bf16.mxu0 %v2730_v25  ;;  %2538 = vmatprep.subr.bf16.mxu1 %v2736_v29  ;;  %v2753_v43 = vld [vmem:[#allocation8] ss:$12 sps:$4 sm:$0xff]   ;;  %v2754_v44 = vld [vmem:[#allocation8 + $0x8] ss:$12 sps:$4 sm:$0xff]   ;;  %v3240_v58 = vshrl.u32 %v179_v54, 7  ;;  %s3134_s29 = smov 32  }
  0x62   :  { %v133_v60 = vld [vmem:[%s3687_s6] sm:$0xf]  ;;  %vm582_vm9 = vcmask 130048   ;;  %vm1042_vm13 = vcmask 523264   ;;  %vm1045_vm14 = vcmask 785408  }
  0x63   :  { %v181_v59 = vsub.s32 0, %v3240_v58 }
  0x64   :  { %362 = vmatpush1.bf16.msra.mxu0 %v2733_v27  ;;  %2539 = vmatpush3.bf16.msra.mxu1 %v2736_v29 }
  0x65   :  { %363 = vmatprep.subr.bf16.mxu0 %v2734_v28  ;;  %2540 = vmatprep.subr.bf16.mxu1 %v2740_v32  ;;  %v182_v63 = vrot.slane %v133_v60, %v181_v59 }
  0x68   :  { %364 = vmatpush1.bf16.msra.mxu0 %v2737_v30  ;;  %2541 = vmatpush3.bf16.msra.mxu1 %v2740_v32 }
  0x69   :  { %365 = vmatprep.subr.bf16.mxu0 %v2738_v31  ;;  %2542 = vmatprep.subr.bf16.mxu1 %v2744_v35 }
  0x6c   :  { %366 = vmatpush1.bf16.msra.mxu0 %v2741_v33  ;;  %2543 = vmatpush3.bf16.msra.mxu1 %v2744_v35 }
  0x6d   :  { %367 = vmatprep.subr.bf16.mxu0 %v2742_v34  ;;  %2544 = vmatprep.subr.bf16.mxu1 %v2748_v38 }
  0x70   :  { %368 = vmatpush1.bf16.msra.mxu0 %v2745_v36  ;;  %2545 = vmatpush3.bf16.msra.mxu1 %v2748_v38 }
  0x71   :  { %369 = vmatprep.subr.bf16.mxu0 %v2746_v37  ;;  %2546 = vmatprep.subr.bf16.mxu1 %v2752_v42  ;;  %v3301_v37 = vand.u32 127, %v179_v54 }
  0x73   :  { %v473_v38 = vand.u32 31, %v3301_v37  ;;  %vm486_vm4 = vcmp.le.s32.totalorder %v3301_v37, %v3240_v58 }
  0x74   :  { %370 = vmatpush1.bf16.msra.mxu0 %v2749_v40  ;;  %2547 = vmatpush3.bf16.msra.mxu1 %v2752_v42 }
  0x75   :  { %371 = vmatprep.subr.bf16.mxu0 %v2750_v41  ;;  %2548 = vmatprep.subr.bf16.mxu1 %v2754_v44  ;;  %vm3304_vm1 = vcmp.lt.s32.totalorder %v473_v38, 16 }
  0x78   :  { %372 = vmatpush1.bf16.msra.mxu0 %v2753_v43  ;;  %2549 = vmatpush3.bf16.msra.mxu1 %v2754_v44 }
  0xe2   :  { %v135_v6 = vpop.xlane.xlu0 %134  ;;  %v139_v7 = vpop.xlane.xlu1 %138 }
  0xe3   :  { %v143_v8 = vmul.f32 0.0078125, %v135_v6  ;;  %v145_v9 = vmul.f32 0.0078125, %v139_v7 }
  0xe5   :  { %v3222_v10 = vsub.f32 %v129_v0, %v143_v8  ;;  %v3224_v11 = vsub.f32 %v131_v1, %v145_v9  ;;  %v189_v0 = vsub.s32 1, %v3240_v58 }
  0xe6   :  { %v137_v12 = vpop.xlane.xlu0 %136  ;;  %v141_v13 = vpop.xlane.xlu1 %140 }
  0xe7   :  { %v144_v14 = vmul.f32 0.0078125, %v137_v12  ;;  %v151_v15 = vmul.f32 %v3222_v10, %v3222_v10  ;;  %v146_v16 = vmul.f32 0.0078125, %v141_v13  ;;  %v153_v19 = vmul.f32 %v3224_v11, %v3224_v11 }
  0xe8   :  { %v190_v5 = vrot.slane %v133_v60, %v189_v0 }
  0xe9   :  { %v3228_v17 = vsub.f32 %v130_v2, %v144_v14  ;;  %155 = vadd.xlane.f32.xlu0 %v151_v15  ;;  %v3230_v18 = vsub.f32 %v132_v3, %v146_v16 }
  0xeb   :  { %v152_v20 = vmul.f32 %v3228_v17, %v3228_v17  ;;  %v154_v21 = vmul.f32 %v3230_v18, %v3230_v18 }
  0xed   :  { %159 = vadd.xlane.f32.xlu0 %v153_v19  ;;  %157 = vadd.xlane.f32.xlu1 %v152_v20  ;;  %v3130_v20 = vmov 0.0  }
  0xee   :  { %2560 = vmatprep.subr.bf16.mxu0 %v3130_v20  ;;  %2554 = vmatprep.subr.bf16.mxu1 %v3130_v20 }
  0xf1   :  { %161 = vadd.xlane.f32.xlu1 %v154_v21 }
 0x172   :  { %v156_v45 = vpop.xlane.xlu0 %155 }
 0x173   :  { %v163_v46 = vmul.f32 0.0078125, %v156_v45  ;;  %v465_v45 = vld [vmem:[#allocation5] sm:$0xff] }
 0x175   :  { %v167_v47 = vadd.f32 1e-05, %v163_v46 }
 0x176   :  { %v158_v48 = vpop.xlane.xlu1 %157  ;;  %v160_v49 = vpop.xlane.xlu0 %159 }
 0x177   :  { %2827 = vrsqrt.f32 %v167_v47  ;;  %v164_v50 = vmul.f32 0.0078125, %v158_v48  ;;  %v165_v51 = vmul.f32 0.0078125, %v160_v49  ;;  %v463_v47 = vld [vmem:[#allocation2] sm:$0xff]  ;;  %v464_v48 = vld [vmem:[#allocation2 + $0x8] sm:$0xff]  ;;  %v466_v49 = vld [vmem:[#allocation5 + $0x8] sm:$0xff] }
 0x179   :  { %v168_v52 = vadd.f32 1e-05, %v164_v50  ;;  %v169_v53 = vadd.f32 1e-05, %v165_v51 }
 0x17a   :  { %v162_v55 = vpop.xlane.xlu1 %161 }
 0x17b   :  { %2829 = vrsqrt.f32 %v168_v52  ;;  %v166_v56 = vmul.f32 0.0078125, %v162_v55 }
 0x17c   :  { %2831 = vrsqrt.f32 %v169_v53 }
 0x17d   :  { %v170_v57 = vadd.f32 1e-05, %v166_v56 }
 0x17f   :  { %2833 = vrsqrt.f32 %v170_v57 }
 0x184   :  { %v2828_v61 = vpop.eup %2827 }
 0x185   :  { %v175_v62 = vmul.f32 %v2828_v61, %v3222_v10 }
 0x187   :  { %v183_v4 = vmul.f32 %v182_v63, %v175_v62 }
 0x188   :  { %v2830_v1 = vpop.eup %2829 }
 0x189   :  { %v2832_v2 = vpop.eup %2831  ;;  %v176_v3 = vmul.f32 %v2830_v1, %v3228_v17  ;;  %v191_v9 = vadd.f32 %v190_v5, %v183_v4 }
 0x18a   :  { %v177_v6 = vmul.f32 %v2832_v2, %v3224_v11 }
 0x18b   :  { %v184_v7 = vmul.f32 %v182_v63, %v176_v3 }
 0x18c   :  { %v2834_v8 = vpop.eup %2833  ;;  %v185_v13 = vmul.f32 %v182_v63, %v177_v6 }
 0x18d   :  { %v192_v12 = vadd.f32 %v190_v5, %v184_v7  ;;  %v178_v10 = vmul.f32 %v2834_v8, %v3230_v18 }
 0x18e   :  { %v193_v16 = vadd.f32 %v190_v5, %v185_v13 }
 0x18f   :  { %v195_v14 = vpack.c.bf16 %v192_v12, %v191_v9  ;;  %v186_v15 = vmul.f32 %v182_v63, %v178_v10 }
 0x191   :  { %390 = vmatmul.mubr.bf16.vlgmr.msra.gmra.mxu0 %v195_v14  ;;  %2550 = vmatprep.mubr.bf16.mxu1 %v195_v14  ;;  %v194_v19 = vadd.f32 %v190_v5, %v186_v15 }
 0x192   :  { %399 = vmatprep.mubr.bf16.mxu0 %v3129_v39 }
 0x193   :  { %v196_v17 = vpack.c.bf16 %v194_v19, %v193_v16 }
 0x195   :  { %2551 = vmatmul.mubr.bf16.vlgmr.msra.gmra.mxu1 %v196_v17 }
 0x196   :  { %2556 = vmatprep.mubr.msk.bf16.mxu1 %vm3132_vm0, %v3130_v20 }
 0x199   :  { %400 = vmatmul.mubr.bf16.gmra.mxu0 %v196_v17 }
 0x19a   :  { %2562 = vmatprep.mubr.msk.bf16.mxu0 %vm3132_vm0, %v3130_v20 }
 0x251   :  { %v391_v11 = vpop.f32.mrf.mxu0 }
 0x252   :  { %v3260_v23 = vmul.f32 0.17677669, %v391_v11 }
 0x253   :  { %v393_v21 = vpop.f32.mrf.mxu0 }
 0x254   :  { %508 = vrot.lane.b32.xlu1 %v393_v21, %s3122_s26  ;;  %504 = vrot.lane.b32.xlu0 %v393_v21, %s3131_s28  ;;  %v514_v54 = vmul.f32 %v463_v47, %v393_v21  ;;  %v498_v7 = vmul.f32 %v463_v47, %v3260_v23 }
 0x255   :  { %v395_v18 = vpop.f32.mrf.mxu0  ;;  %v2552_v22 = vpop.f32.mrf.mxu1 }
 0x256   :  { %v460_v31 = vmul.f32 0.17677669, %v395_v18 }
 0x257   :  { %v397_v24 = vpop.f32.mrf.mxu0  ;;  %v444_v25 = vpop.f32.mrf.mxu1 }
 0x258   :  { %488 = vrot.lane.b32.xlu0 %v3260_v23, %s3131_s28  ;;  %506 = vrot.lane.b32.xlu1 %v397_v24, %s3131_s28  ;;  %v515_v55 = vmul.f32 %v464_v48, %v397_v24  ;;  %v499_v8 = vmul.f32 %v464_v48, %v460_v31 }
 0x259   :  { %v2553_v26 = vpop.f32.mrf.mxu1  ;;  %v401_v28 = vpop.f32.mrf.mxu0 }
 0x25a   :  { %v3265_v27 = vpack.c.bf16 %v2553_v26, %v2552_v22  ;;  %v3286_v34 = vmul.f32 0.17677669, %v401_v28 }
 0x25b   :  { %v447_v29 = vpop.f32.mrf.mxu1  ;;  %v3277_v32 = vpop.f32.mrf.mxu0 }
 0x25c   :  { %v3267_v30 = vpack.c.bf16 %v447_v29, %v444_v25  ;;  %492 = vrot.lane.b32.xlu0 %v3260_v23, %s3122_s26  ;;  %510 = vrot.lane.b32.xlu1 %v397_v24, %s3122_s26  ;;  %v1074_v21 = vmul.f32 %v463_v47, %v3277_v32 }
 0x25d   :  { %v405_v33 = vpop.f32.mrf.mxu0 }
 0x25e   :  { %2561 = vmatpush3.bf16.msra.mxu0 %v3267_v30  ;;  %v3294_v36 = vmul.f32 0.17677669, %v405_v33 }
 0x25f   :  { %2572 = vmatprep.subr.bf16.mxu0 %v3130_v20  ;;  %v407_v35 = vpop.f32.mrf.mxu0 }
 0x260   :  { %490 = vrot.lane.b32.xlu1 %v460_v31, %s3131_s28  ;;  %1064 = vrot.lane.b32.xlu0 %v3277_v32, %s3131_s28  ;;  %v1075_v18 = vmul.f32 %v464_v48, %v407_v35  ;;  %v1059_v38 = vmul.f32 %v464_v48, %v3294_v36 }
 0x264   :  { %494 = vrot.lane.b32.xlu1 %v460_v31, %s3122_s26  ;;  %1068 = vrot.lane.b32.xlu0 %v3277_v32, %s3122_s26 }
 0x268   :  { %1048 = vrot.lane.b32.xlu0 %v3286_v34, %s3131_s28  ;;  %1066 = vrot.lane.b32.xlu1 %v407_v35, %s3131_s28 }
 0x26c   :  { %1052 = vrot.lane.b32.xlu0 %v3286_v34, %s3122_s26  ;;  %1070 = vrot.lane.b32.xlu1 %v407_v35, %s3122_s26  ;;  %v1058_v35 = vmul.f32 %v463_v47, %v3286_v34 }
 0x270   :  { %1050 = vrot.lane.b32.xlu1 %v3294_v36, %s3131_s28 }
 0x274   :  { %1054 = vrot.lane.b32.xlu1 %v3294_v36, %s3122_s26  ;;  %s3133_s26 = smov 96  }
 0x2c6   :  { %v509_v40 = vpop.permute.xlu1 %508  ;;  %v505_v41 = vpop.permute.xlu0 %504 }
 0x2c7   :  { %v512_v46 = vsel %vm3304_vm1, %v505_v41, %v509_v40 }
 0x2c8   :  { %v516_v50 = vmul.f32 %v512_v46, %v465_v45 }
 0x2ca   :  { %v507_v43 = vpop.permute.xlu1 %506  ;;  %v489_v44 = vpop.permute.xlu0 %488  ;;  %v518_v57 = vadd.f32 %v516_v50, %v514_v54 }
 0x2ce   :  { %v511_v51 = vpop.permute.xlu1 %510  ;;  %v493_v52 = vpop.permute.xlu0 %492 }
 0x2cf   :  { %v513_v53 = vsel %vm3304_vm1, %v507_v43, %v511_v51  ;;  %v496_v63 = vsel %vm3304_vm1, %v489_v44, %v493_v52 }
 0x2d0   :  { %v517_v56 = vmul.f32 %v513_v53, %v466_v49  ;;  %v500_v2 = vmul.f32 %v496_v63, %v465_v45  ;;  %v482_v63 = vld [vmem:[%s3681_s0] sm:$0x3] }
 0x2d1   :  { %vm523_vm3 = vcmp.gt.f32.partialorder %v482_v63, 0.5 }
 0x2d2   :  { %v519_v60 = vadd.f32 %v517_v56, %v515_v55  ;;  %v491_v61 = vpop.permute.xlu1 %490  ;;  %v1065_v62 = vpop.permute.xlu0 %1064  ;;  %v502_v12 = vadd.f32 %v500_v2, %v498_v7 }
 0x2d4   :  { %v522_v1 = vpack.c.bf16 %v519_v60, %v518_v57 }
 0x2d6   :  { %v495_v3 = vpop.permute.xlu1 %494  ;;  %654 = vrot.lane.b32.xlu0 %v522_v1, %s3133_s26  ;;  %v1069_v4 = vpop.permute.xlu0 %1068  ;;  %v539_v5 = vsel %vm534_vm2, %v522_v1, 0 }
 0x2d7   :  { %v497_v6 = vsel %vm3304_vm1, %v491_v61, %v495_v3  ;;  %2555 = vmatpush3.bf16.xpose.msra.mxu1 %v539_v5  ;;  %v1072_v15 = vsel %vm3304_vm1, %v1065_v62, %v1069_v4  ;;  %v485_v3 = vadd.s32 8, %v3240_v58  ;;  %v3135_v4 = vmov -1e+09  }
 0x2d8   :  { %v501_v9 = vmul.f32 %v497_v6, %v466_v49  ;;  %2566 = vmatprep.subr.bf16.mxu1 %v3130_v20  ;;  %v1076_v19 = vmul.f32 %v1072_v15, %v465_v45 }
 0x2d9   :  { %vm487_vm7 = vcmp.le.s32.totalorder %v3301_v37, %v485_v3 }
 0x2da   :  { %v503_v10 = vadd.f32 %v501_v9, %v499_v8  ;;  %v1067_v13 = vpop.permute.xlu1 %1066  ;;  %776 = vrot.lane.b32.xlu0 %v522_v1, %s3126_s1  ;;  %v1049_v14 = vpop.permute.xlu0 %1048  ;;  %v1078_v24 = vadd.f32 %v1076_v19, %v1074_v21 }
 0x2dc   :  { %v521_v16 = vpack.c.bf16 %v503_v10, %v502_v12 }
 0x2de   :  { %v1071_v17 = vpop.permute.xlu1 %1070  ;;  %897 = vrot.lane.b32.xlu0 %v522_v1, %s3134_s29  ;;  %651 = vrot.lane.b32.xlu1 %v521_v16, %s3133_s26  ;;  %v1053_v23 = vpop.permute.xlu0 %1052  ;;  %v524_v1 = vsel %vm523_vm3, 1, %v3129_v39 }
 0x2df   :  { %v1073_v11 = vsel %vm3304_vm1, %v1067_v13, %v1071_v17  ;;  %2557 = vmatmul.mubr.msk.bf16.vlgmr.msra.gmra.mxu1 %vm534_vm2, %v521_v16  ;;  %v1056_v28 = vsel %vm3304_vm1, %v1049_v14, %v1053_v23  ;;  %v528_v2 = vrot.slane %v524_v1, %v181_v59 }
 0x2e0   :  { %v1077_v22 = vmul.f32 %v1073_v11, %v466_v49  ;;  %2568 = vmatprep.mubr.msk.bf16.mxu1 %vm3132_vm0, %v3130_v20  ;;  %v1060_v31 = vmul.f32 %v1056_v28, %v465_v45 }
 0x2e1   :  { %vm529_vm5 = vcmp.eq.s32.totalorder %v528_v2, 1 }
 0x2e2   :  { %v1079_v25 = vadd.f32 %v1077_v22, %v1075_v18  ;;  %v1051_v26 = vpop.permute.xlu1 %1050  ;;  %774 = vrot.lane.b32.xlu1 %v521_v16, %s3126_s1  ;;  %v1062_v41 = vadd.f32 %v1060_v31, %v1058_v35  ;;  %vm530_vm6 = vmand %vm486_vm4, %vm529_vm5 }
 0x2e3   :  { %v532_v5 = vsel %vm530_vm6, 0.0, %v3135_v4  ;;  %vm531_vm8 = vmand %vm487_vm7, %vm529_vm5 }
 0x2e4   :  { %v1082_v29 = vpack.c.bf16 %v1079_v25, %v1078_v24  ;;  %v533_v8 = vsel %vm531_vm8, 0.0, %v3135_v4 }
 0x2e6   :  { %v1055_v33 = vpop.permute.xlu1 %1054  ;;  %895 = vrot.lane.b32.xlu1 %v521_v16, %s3134_s29  ;;  %1210 = vrot.lane.b32.xlu0 %v1082_v29, %s3133_s26  ;;  %v1096_v51 = vsel %vm534_vm2, %v1082_v29, 0 }
 0x2e7   :  { %v1057_v32 = vsel %vm3304_vm1, %v1051_v26, %v1055_v33 }
 0x2e8   :  { %v1061_v40 = vmul.f32 %v1057_v32, %v466_v49 }
 0x2ea   :  { %v1063_v43 = vadd.f32 %v1061_v40, %v1059_v38  ;;  %1332 = vrot.lane.b32.xlu0 %v1082_v29, %s3126_s1 }
 0x2ec   :  { %v1081_v44 = vpack.c.bf16 %v1063_v43, %v1062_v41 }
 0x2ee   :  { %1453 = vrot.lane.b32.xlu0 %v1082_v29, %s3134_s29  ;;  %1207 = vrot.lane.b32.xlu1 %v1081_v44, %s3133_s26  ;;  %v1086_v29 = vrot.slane %v524_v1, %v189_v0 }
 0x2f0   :  { %vm1087_vm10 = vcmp.eq.s32.totalorder %v1086_v29, 1 }
 0x2f1   :  { %vm1088_vm11 = vmand %vm486_vm4, %vm1087_vm10 }
 0x2f2   :  { %1330 = vrot.lane.b32.xlu1 %v1081_v44, %s3126_s1  ;;  %vm1089_vm12 = vmand %vm487_vm7, %vm1087_vm10 }
 0x2f6   :  { %1451 = vrot.lane.b32.xlu1 %v1081_v44, %s3134_s29 }
 0x348   :  { %v655_v42 = vpop.permute.xlu0 %654 }
 0x349   :  { %v660_v45 = vsel %vm534_vm2, %v655_v42, 0  ;;  %v1090_v42 = vsel %vm1088_vm11, 0.0, %v3135_v4 }
 0x34a   :  { %2567 = vmatpush3.bf16.xpose.msra.mxu1 %v660_v45 }
 0x34b   :  { %2578 = vmatprep.subr.bf16.mxu1 %v3130_v20 }
 0x34c   :  { %v777_v34 = vpop.permute.xlu0 %776 }
 0x34d   :  { %v782_v46 = vsel %vm534_vm2, %v777_v34, 0 }
 0x350   :  { %v652_v36 = vpop.permute.xlu1 %651  ;;  %v898_v47 = vpop.permute.xlu0 %897 }
 0x351   :  { %2569 = vmatmul.mubr.msk.bf16.vlgmr.msra.gmra.mxu1 %vm534_vm2, %v652_v36  ;;  %v903_v49 = vsel %vm534_vm2, %v898_v47, 0  ;;  %v1091_v47 = vsel %vm1089_vm12, 0.0, %v3135_v4 }
 0x352   :  { %2579 = vmatpush3.bf16.xpose.msra.mxu1 %v782_v46  ;;  %2580 = vmatprep.mubr.msk.bf16.mxu1 %vm3132_vm0, %v3130_v20 }
 0x353   :  { %2590 = vmatprep.subr.bf16.mxu1 %v3130_v20 }
 0x354   :  { %v775_v48 = vpop.permute.xlu1 %774 }
 0x358   :  { %v896_v50 = vpop.permute.xlu1 %895  ;;  %v1211_v52 = vpop.permute.xlu0 %1210 }
 0x359   :  { %2581 = vmatmul.mubr.msk.bf16.vlgmr.msra.gmra.mxu1 %vm534_vm2, %v775_v48  ;;  %v1216_v53 = vsel %vm534_vm2, %v1211_v52, 0 }
 0x35a   :  { %2591 = vmatpush3.bf16.xpose.msra.mxu1 %v903_v49  ;;  %2592 = vmatprep.mubr.msk.bf16.mxu1 %vm3132_vm0, %v3130_v20 }
 0x35b   :  { %2602 = vmatprep.subr.bf16.mxu1 %v3130_v20 }
 0x35c   :  { %v1333_v54 = vpop.permute.xlu0 %1332 }
 0x35d   :  { %v1338_v56 = vsel %vm534_vm2, %v1333_v54, 0 }
 0x360   :  { %v1208_v55 = vpop.permute.xlu1 %1207  ;;  %v1454_v57 = vpop.permute.xlu0 %1453 }
 0x361   :  { %2593 = vmatmul.mubr.msk.bf16.vlgmr.msra.gmra.mxu1 %vm534_vm2, %v896_v50  ;;  %v1459_v61 = vsel %vm534_vm2, %v1454_v57, 0 }
 0x362   :  { %2603 = vmatpush3.bf16.xpose.msra.mxu1 %v1096_v51  ;;  %2604 = vmatprep.mubr.msk.bf16.mxu1 %vm3132_vm0, %v3130_v20 }
 0x363   :  { %2614 = vmatprep.subr.bf16.mxu1 %v3130_v20 }
 0x364   :  { %v1331_v60 = vpop.permute.xlu1 %1330 }
 0x368   :  { %v1452_v62 = vpop.permute.xlu1 %1451 }
 0x369   :  { %2605 = vmatmul.mubr.msk.bf16.vlgmr.msra.gmra.mxu1 %vm534_vm2, %v1081_v44 }
 0x36a   :  { %2615 = vmatpush3.bf16.xpose.msra.mxu1 %v1216_v53  ;;  %2616 = vmatprep.mubr.msk.bf16.mxu1 %vm3132_vm0, %v3130_v20 }
 0x36b   :  { %2626 = vmatprep.subr.bf16.mxu1 %v3130_v20 }
 0x371   :  { %2617 = vmatmul.mubr.msk.bf16.vlgmr.msra.gmra.mxu1 %vm534_vm2, %v1208_v55 }
 0x372   :  { %2627 = vmatpush3.bf16.xpose.msra.mxu1 %v1338_v56  ;;  %2628 = vmatprep.mubr.msk.bf16.mxu1 %vm3132_vm0, %v3130_v20 }
 0x373   :  { %2638 = vmatprep.subr.bf16.mxu1 %v3130_v20 }
 0x379   :  { %2629 = vmatmul.mubr.msk.bf16.vlgmr.msra.gmra.mxu1 %vm534_vm2, %v1331_v60 }
 0x37a   :  { %2639 = vmatpush3.bf16.xpose.msra.mxu1 %v1459_v61  ;;  %2640 = vmatprep.mubr.msk.bf16.mxu1 %vm3132_vm0, %v3130_v20 }
 0x381   :  { %2641 = vmatmul.mubr.msk.bf16.vlgmr.msra.gmra.mxu1 %vm534_vm2, %v1452_v62 }
 0x39f   :  { %v575_v6 = vpop.f32.mrf.mxu1 }
 0x3a0   :  { %v576_v59 = vadd.f32 %v575_v6, %v532_v5 }
 0x3a1   :  { %v2558_v7 = vpop.f32.mrf.mxu1 }
 0x3a2   :  { %v583_v9 = vsel %vm582_vm9, %v576_v59, -inf }
 0x3a3   :  { %v578_v12 = vpop.f32.mrf.mxu1  ;;  %584 = vmax.xlane.f32.xlu0 %v583_v9 }
 0x3a4   :  { %v579_v10 = vadd.f32 %v578_v12, %v533_v8 }
 0x3a5   :  { %v2559_v13 = vpop.f32.mrf.mxu1 }
 0x3a6   :  { %v586_v14 = vsel %vm582_vm9, %v579_v10, -inf }
 0x3a7   :  { %587 = vmax.xlane.f32.xlu1 %v586_v14 }
 0x411   :  { %v696_v15 = vpop.f32.mrf.mxu1 }
 0x412   :  { %v3394_v16 = vadd.f32 %v696_v15, %v532_v5 }
 0x413   :  { %v2570_v19 = vpop.f32.mrf.mxu1 }
 0x414   :  { %v703_v17 = vsel %vm582_vm9, %v3394_v16, -inf }
 0x415   :  { %704 = vmax.xlane.f32.xlu0 %v703_v17  ;;  %v699_v11 = vpop.f32.mrf.mxu1 }
 0x416   :  { %v3398_v21 = vadd.f32 %v699_v11, %v533_v8 }
 0x417   :  { %v2571_v18 = vpop.f32.mrf.mxu1 }
 0x418   :  { %v706_v22 = vsel %vm582_vm9, %v3398_v21, -inf }
 0x419   :  { %707 = vmax.xlane.f32.xlu0 %v706_v22  ;;  %v818_v23 = vpop.f32.mrf.mxu1 }
 0x41a   :  { %v3402_v24 = vadd.f32 %v818_v23, %v532_v5 }
 0x41b   :  { %v2582_v25 = vpop.f32.mrf.mxu1 }
 0x41c   :  { %v825_v26 = vsel %vm582_vm9, %v3402_v24, -inf }
 0x41d   :  { %826 = vmax.xlane.f32.xlu0 %v825_v26  ;;  %v821_v28 = vpop.f32.mrf.mxu1 }
 0x41e   :  { %v3408_v31 = vadd.f32 %v821_v28, %v533_v8 }
 0x41f   :  { %v2583_v33 = vpop.f32.mrf.mxu1 }
 0x420   :  { %v828_v32 = vsel %vm582_vm9, %v3408_v31, -inf }
 0x421   :  { %829 = vmax.xlane.f32.xlu1 %v828_v32  ;;  %v939_v35 = vpop.f32.mrf.mxu1 }
 0x422   :  { %v3412_v38 = vadd.f32 %v939_v35, %v532_v5 }
 0x423   :  { %v2594_v40 = vpop.f32.mrf.mxu1 }
 0x424   :  { %v946_v41 = vsel %vm582_vm9, %v3412_v38, -inf }
 0x425   :  { %947 = vmax.xlane.f32.xlu0 %v946_v41  ;;  %v942_v0 = vpop.f32.mrf.mxu1 }
 0x426   :  { %v3419_v43 = vadd.f32 %v942_v0, %v533_v8 }
 0x427   :  { %v2595_v44 = vpop.f32.mrf.mxu1 }
 0x428   :  { %v949_v45 = vsel %vm582_vm9, %v3419_v43, -inf }
 0x429   :  { %950 = vmax.xlane.f32.xlu1 %v949_v45  ;;  %v1132_v34 = vpop.f32.mrf.mxu1 }
 0x42a   :  { %v3425_v36 = vadd.f32 %v1132_v34, %v1090_v42 }
 0x42b   :  { %v2606_v46 = vpop.f32.mrf.mxu1 }
 0x42c   :  { %v585_v48 = vpop.xlane.xlu0 %584  ;;  %v1139_v49 = vsel %vm582_vm9, %v3425_v36, -inf }
 0x42d   :  { %v589_v50 = vsub.f32 %v576_v59, %v585_v48  ;;  %1140 = vmax.xlane.f32.xlu0 %v1139_v49  ;;  %v1135_v51 = vpop.f32.mrf.mxu1 }
 0x42e   :  { %v3429_v52 = vadd.f32 %v1135_v51, %v1091_v47 }
 0x42f   :  { %v591_v53 = vmul.f32 1.442695, %v589_v50  ;;  %v2607_v54 = vpop.f32.mrf.mxu1 }
 0x430   :  { %v588_v55 = vpop.xlane.xlu1 %587  ;;  %v1142_v37 = vsel %vm582_vm9, %v3429_v52, -inf }
 0x431   :  { %2835 = vpow2.f32 %v591_v53  ;;  %v590_v56 = vsub.f32 %v579_v10, %v588_v55  ;;  %1143 = vmax.xlane.f32.xlu1 %v1142_v37  ;;  %v1252_v57 = vpop.f32.mrf.mxu1 }
 0x432   :  { %v3433_v60 = vadd.f32 %v1252_v57, %v1090_v42 }
 0x433   :  { %v593_v61 = vmul.f32 1.442695, %v590_v56  ;;  %v2618_v62 = vpop.f32.mrf.mxu1 }
 0x434   :  { %v1259_v63 = vsel %vm582_vm9, %v3433_v60, -inf }
 0x435   :  { %2837 = vpow2.f32 %v593_v61  ;;  %1260 = vmax.xlane.f32.xlu0 %v1259_v63  ;;  %v1255_v1 = vpop.f32.mrf.mxu1 }
 0x436   :  { %v3437_v2 = vadd.f32 %v1255_v1, %v1091_v47 }
 0x437   :  { %v2619_v3 = vpop.f32.mrf.mxu1 }
 0x438   :  { %v1262_v4 = vsel %vm582_vm9, %v3437_v2, -inf }
 0x439   :  { %1263 = vmax.xlane.f32.xlu1 %v1262_v4  ;;  %v1374_v5 = vpop.f32.mrf.mxu1 }
 0x43a   :  { %v3441_v6 = vadd.f32 %v1374_v5, %v1090_v42 }
 0x43b   :  { %v2630_v59 = vpop.f32.mrf.mxu1 }
 0x43c   :  { %v1381_v7 = vsel %vm582_vm9, %v3441_v6, -inf }
 0x43d   :  { %1382 = vmax.xlane.f32.xlu0 %v1381_v7  ;;  %v1377_v8 = vpop.f32.mrf.mxu1 }
 0x43e   :  { %v3445_v9 = vpop.eup %2835  ;;  %v3447_v12 = vadd.f32 %v1377_v8, %v1091_v47 }
 0x43f   :  { %v2631_v10 = vpop.f32.mrf.mxu1  ;;  %v595_v14 = vsel %vm582_vm9, %v3445_v9, 0.0 }
 0x440   :  { %v1384_v13 = vsel %vm582_vm9, %v3447_v12, -inf }
 0x441   :  { %1385 = vmax.xlane.f32.xlu1 %v1384_v13  ;;  %v1495_v15 = vpop.f32.mrf.mxu1  ;;  %596 = vadd.xlane.f32.xlu0 %v595_v14 }
 0x442   :  { %v3453_v19 = vpop.eup %2837  ;;  %v3455_v17 = vadd.f32 %v1495_v15, %v1090_v42 }
 0x443   :  { %v2642_v11 = vpop.f32.mrf.mxu1  ;;  %v598_v18 = vsel %vm582_vm9, %v3453_v19, 0.0 }
 0x444   :  { %v1502_v22 = vsel %vm582_vm9, %v3455_v17, -inf }
 0x445   :  { %599 = vadd.xlane.f32.xlu1 %v598_v18  ;;  %v1498_v23 = vpop.f32.mrf.mxu1  ;;  %1503 = vmax.xlane.f32.xlu0 %v1502_v22 }
 0x446   :  { %v3461_v25 = vadd.f32 %v1498_v23, %v1091_v47 }
 0x447   :  { %v2643_v26 = vpop.f32.mrf.mxu1 }
 0x448   :  { %v1505_v28 = vsel %vm582_vm9, %v3461_v25, -inf }
 0x449   :  { %1506 = vmax.xlane.f32.xlu1 %v1505_v28 }
 0x45a   :  { %848 = vrot.lane.b32.xlu1 %v3267_v30, %s3126_s1 }
 0x45b   :  { %727 = vrot.lane.b32.xlu0 %v3267_v30, %s3133_s26 }
 0x49e   :  { %v705_v29 = vpop.xlane.xlu0 %704 }
 0x49f   :  { %v709_v33 = vsub.f32 %v3394_v16, %v705_v29 }
 0x4a1   :  { %v711_v32 = vmul.f32 1.442695, %v709_v33 }
 0x4a2   :  { %v708_v35 = vpop.xlane.xlu0 %707 }
 0x4a3   :  { %2839 = vpow2.f32 %v711_v32  ;;  %v710_v40 = vsub.f32 %v3398_v21, %v708_v35 }
 0x4a5   :  { %v713_v41 = vmul.f32 1.442695, %v710_v40 }
 0x4a6   :  { %v827_v0 = vpop.xlane.xlu0 %826 }
 0x4a7   :  { %2841 = vpow2.f32 %v713_v41  ;;  %v831_v44 = vsub.f32 %v3402_v24, %v827_v0 }
 0x4a9   :  { %v833_v42 = vmul.f32 1.442695, %v831_v44 }
 0x4aa   :  { %v830_v45 = vpop.xlane.xlu1 %829 }
 0x4ab   :  { %2843 = vpow2.f32 %v833_v42  ;;  %v832_v34 = vsub.f32 %v3408_v31, %v830_v45 }
 0x4ad   :  { %v835_v46 = vmul.f32 1.442695, %v832_v34 }
 0x4ae   :  { %v948_v47 = vpop.xlane.xlu0 %947 }
 0x4af   :  { %2845 = vpow2.f32 %v835_v46  ;;  %v952_v16 = vsub.f32 %v3412_v38, %v948_v47 }
 0x4b0   :  { %v3474_v48 = vpop.eup %2839 }
 0x4b1   :  { %v954_v49 = vmul.f32 1.442695, %v952_v16  ;;  %v715_v21 = vsel %vm582_vm9, %v3474_v48, 0.0 }
 0x4b2   :  { %v951_v50 = vpop.xlane.xlu1 %950  ;;  %716 = vadd.xlane.f32.xlu0 %v715_v21 }
 0x4b3   :  { %2847 = vpow2.f32 %v954_v49  ;;  %v953_v24 = vsub.f32 %v3419_v43, %v951_v50 }
 0x4b4   :  { %v3479_v51 = vpop.eup %2841 }
 0x4b5   :  { %v956_v53 = vmul.f32 1.442695, %v953_v24  ;;  %v718_v31 = vsel %vm582_vm9, %v3479_v51, 0.0 }
 0x4b6   :  { %719 = vadd.xlane.f32.xlu1 %v718_v31  ;;  %v1141_v54 = vpop.xlane.xlu0 %1140 }
 0x4b7   :  { %2849 = vpow2.f32 %v956_v53  ;;  %v1145_v38 = vsub.f32 %v3425_v36, %v1141_v54 }
 0x4b8   :  { %v3484_v55 = vpop.eup %2843 }
 0x4b9   :  { %v1147_v37 = vmul.f32 1.442695, %v1145_v38  ;;  %v837_v56 = vsel %vm582_vm9, %v3484_v55, 0.0 }
 0x4ba   :  { %v1144_v57 = vpop.xlane.xlu1 %1143  ;;  %838 = vadd.xlane.f32.xlu0 %v837_v56 }
 0x4bb   :  { %2851 = vpow2.f32 %v1147_v37  ;;  %v1146_v43 = vsub.f32 %v3429_v52, %v1144_v57 }
 0x4bc   :  { %v3489_v61 = vpop.eup %2845 }
 0x4bd   :  { %v1149_v62 = vmul.f32 1.442695, %v1146_v43  ;;  %v840_v63 = vsel %vm582_vm9, %v3489_v61, 0.0 }
 0x4be   :  { %841 = vadd.xlane.f32.xlu1 %v840_v63  ;;  %v1261_v1 = vpop.xlane.xlu0 %1260 }
 0x4bf   :  { %2853 = vpow2.f32 %v1149_v62  ;;  %v1265_v36 = vsub.f32 %v3433_v60, %v1261_v1 }
 0x4c0   :  { %v3494_v3 = vpop.eup %2847 }
 0x4c1   :  { %v1267_v4 = vmul.f32 1.442695, %v1265_v36  ;;  %v958_v5 = vsel %vm582_vm9, %v3494_v3, 0.0 }
 0x4c2   :  { %v1264_v59 = vpop.xlane.xlu1 %1263  ;;  %959 = vadd.xlane.f32.xlu0 %v958_v5 }
 0x4c3   :  { %2855 = vpow2.f32 %v1267_v4  ;;  %v1266_v52 = vsub.f32 %v3437_v2, %v1264_v59 }
 0x4c4   :  { %v3499_v7 = vpop.eup %2849 }
 0x4c5   :  { %v1269_v8 = vmul.f32 1.442695, %v1266_v52  ;;  %v961_v10 = vsel %vm582_vm9, %v3499_v7, 0.0 }
 0x4c6   :  { %962 = vadd.xlane.f32.xlu1 %v961_v10  ;;  %v1383_v13 = vpop.xlane.xlu0 %1382 }
 0x4c7   :  { %2857 = vpow2.f32 %v1269_v8 }
 0x4c8   :  { %v3503_v60 = vpop.eup %2851 }
 0x4c9   :  { %v1151_v14 = vsel %vm582_vm9, %v3503_v60, 0.0 }
 0x4ca   :  { %v1386_v15 = vpop.xlane.xlu1 %1385  ;;  %1152 = vadd.xlane.f32.xlu0 %v1151_v14  ;;  %v597_v11 = vpop.xlane.xlu0 %596 }
 0x4cb   :  { %v1388_v18 = vsub.f32 %v3447_v12, %v1386_v15  ;;  %2859 = vrcp.f32 %v597_v11 }
 0x4cc   :  { %v3508_v2 = vpop.eup %2853 }
 0x4cd   :  { %v1391_v22 = vmul.f32 1.442695, %v1388_v18  ;;  %v1154_v23 = vsel %vm582_vm9, %v3508_v2, 0.0 }
 0x4ce   :  { %v600_v26 = vpop.xlane.xlu1 %599  ;;  %1155 = vadd.xlane.f32.xlu1 %v1154_v23  ;;  %v1504_v28 = vpop.xlane.xlu0 %1503 }
 0x4cf   :  { %2861 = vpow2.f32 %v1391_v22  ;;  %v1508_v29 = vsub.f32 %v3455_v17, %v1504_v28 }
 0x4d0   :  { %v3513_v33 = vpop.eup %2855  ;;  %2863 = vrcp.f32 %v600_v26 }
 0x4d1   :  { %v1510_v32 = vmul.f32 1.442695, %v1508_v29  ;;  %v1271_v12 = vsel %vm582_vm9, %v3513_v33, 0.0 }
 0x4d2   :  { %v1507_v35 = vpop.xlane.xlu1 %1506  ;;  %1272 = vadd.xlane.f32.xlu1 %v1271_v12  ;;  %v728_v21 = vpop.permute.xlu0 %727 }
 0x4d3   :  { %2865 = vpow2.f32 %v1510_v32  ;;  %v1509_v40 = vsub.f32 %v3461_v25, %v1507_v35 }
 0x4d4   :  { %v3518_v41 = vpop.eup %2857 }
 0x4d5   :  { %v1512_v0 = vmul.f32 1.442695, %v1509_v40  ;;  %v1274_v44 = vsel %vm582_vm9, %v3518_v41, 0.0 }
 0x4d6   :  { %1275 = vadd.xlane.f32.xlu1 %v1274_v44  ;;  %v849_v31 = vpop.permute.xlu1 %848 }
 0x4d7   :  { %2867 = vpow2.f32 %v1512_v0 }
 0x4d8   :  { %v2860_v17 = vpop.eup %2859 }
 0x4d9   :  { %v603_v46 = vmul.f32 %v2860_v17, %v3445_v9 }
 0x4dc   :  { %v3522_v42 = vpop.eup %2861 }
 0x4dd   :  { %v2864_v45 = vpop.eup %2863  ;;  %v1396_v34 = vsel %vm582_vm9, %v3522_v42, 0.0 }
 0x4de   :  { %v604_v47 = vmul.f32 %v2864_v45, %v3453_v19  ;;  %1397 = vadd.xlane.f32.xlu1 %v1396_v34 }
 0x4e0   :  { %v3528_v25 = vpop.eup %2865  ;;  %v605_v16 = vpack.c.bf16 %v604_v47, %v603_v46  ;;  %969 = vrot.lane.b32.xlu0 %v3267_v30, %s3134_s29  ;;  %v1387_v30 = vsub.f32 %v3441_v6, %v1383_v13 }
 0x4e1   :  { %v1514_v49 = vsel %vm582_vm9, %v3528_v25, 0.0 }
 0x4e2   :  { %2563 = vmatmul.mubr.msk.bf16.vlgmr.msra.gmra.mxu0 %vm582_vm9, %v605_v16  ;;  %1515 = vadd.xlane.f32.xlu1 %v1514_v49  ;;  %v1389_v50 = vmul.f32 1.442695, %v1387_v30 }
 0x4e3   :  { %2573 = vmatpush3.bf16.msra.mxu0 %v728_v21  ;;  %2574 = vmatprep.mubr.msk.bf16.mxu0 %vm3132_vm0, %v3130_v20 }
 0x4e4   :  { %v3537_v9 = vpop.eup %2867  ;;  %2584 = vmatprep.subr.bf16.mxu0 %v3130_v20  ;;  %2869 = vpow2.f32 %v1389_v50 }
 0x4e5   :  { %v1517_v19 = vsel %vm582_vm9, %v3537_v9, 0.0 }
 0x4e6   :  { %1518 = vadd.xlane.f32.xlu1 %v1517_v19 }
 0x4f1   :  { %v3545_v24 = vpop.eup %2869 }
 0x4f2   :  { %v1393_v53 = vsel %vm582_vm9, %v3545_v24, 0.0 }
 0x4f7   :  { %1283 = vrot.lane.b32.xlu1 %v3265_v27, %s3133_s26 }
 0x4ff   :  { %1394 = vadd.xlane.f32.xlu0 %v1393_v53 }
 0x515   :  { %1404 = vrot.lane.b32.xlu0 %v3265_v27, %s3126_s1 }
 0x519   :  { %1525 = vrot.lane.b32.xlu0 %v3265_v27, %s3134_s29 }
 0x53b   :  { %v717_v6 = vpop.xlane.xlu0 %716 }
 0x53c   :  { %2871 = vrcp.f32 %v717_v6 }
 0x53f   :  { %v720_v54 = vpop.xlane.xlu1 %719 }
 0x540   :  { %2873 = vrcp.f32 %v720_v54 }
 0x543   :  { %v839_v38 = vpop.xlane.xlu0 %838 }
 0x544   :  { %2875 = vrcp.f32 %v839_v38 }
 0x547   :  { %v842_v37 = vpop.xlane.xlu1 %841 }
 0x548   :  { %2877 = vrcp.f32 %v842_v37 }
 0x549   :  { %v2872_v56 = vpop.eup %2871 }
 0x54a   :  { %v723_v62 = vmul.f32 %v2872_v56, %v3474_v48 }
 0x54b   :  { %v960_v57 = vpop.xlane.xlu0 %959 }
 0x54c   :  { %2879 = vrcp.f32 %v960_v57 }
 0x54d   :  { %v2874_v43 = vpop.eup %2873 }
 0x54e   :  { %v724_v63 = vmul.f32 %v2874_v43, %v3479_v51 }
 0x54f   :  { %v963_v1 = vpop.xlane.xlu1 %962 }
 0x550   :  { %2881 = vrcp.f32 %v963_v1  ;;  %v725_v36 = vpack.c.bf16 %v724_v63, %v723_v62 }
 0x551   :  { %v2876_v4 = vpop.eup %2875 }
 0x552   :  { %2575 = vmatmul.mubr.msk.bf16.vlgmr.msra.gmra.mxu0 %vm582_vm9, %v725_v36  ;;  %v845_v52 = vmul.f32 %v2876_v4, %v3484_v55 }
 0x553   :  { %2585 = vmatpush3.bf16.msra.mxu0 %v849_v31  ;;  %v1153_v5 = vpop.xlane.xlu0 %1152  ;;  %2586 = vmatprep.mubr.msk.bf16.mxu0 %vm3132_vm0, %v3130_v20 }
 0x554   :  { %2596 = vmatprep.subr.bf16.mxu0 %v3130_v20  ;;  %2883 = vrcp.f32 %v1153_v5 }
 0x555   :  { %v2878_v59 = vpop.eup %2877 }
 0x556   :  { %v846_v48 = vmul.f32 %v2878_v59, %v3489_v61 }
 0x557   :  { %v1156_v51 = vpop.xlane.xlu1 %1155  ;;  %v970_v10 = vpop.permute.xlu0 %969 }
 0x558   :  { %2885 = vrcp.f32 %v1156_v51  ;;  %v847_v8 = vpack.c.bf16 %v846_v48, %v845_v52  ;;  %v2755_v52 = vld [vmem:[#allocation10 + $0x38] sm:$0xff]   ;;  %v2756_v48 = vld [vmem:[#allocation10 + $0x30] sm:$0xff]  }
 0x559   :  { %v2880_v13 = vpop.eup %2879  ;;  %2650 = vmatprep.subr.bf16.mxu1 %v2755_v52 }
 0x55a   :  { %2587 = vmatmul.mubr.msk.bf16.vlgmr.msra.gmra.mxu0 %vm582_vm9, %v847_v8  ;;  %v966_v11 = vmul.f32 %v2880_v13, %v3494_v3  ;;  %2651 = vmatpush3.bf16.msra.mxu1 %v2755_v52  ;;  %v2757_v8 = vld [vmem:[#allocation10 + $0x28] sm:$0xff]  }
 0x55b   :  { %2597 = vmatpush3.bf16.msra.mxu0 %v970_v10  ;;  %v1273_v14 = vpop.xlane.xlu1 %1272  ;;  %2598 = vmatprep.mubr.msk.bf16.mxu0 %vm3132_vm0, %v3130_v20 }
 0x55c   :  { %2608 = vmatprep.subr.bf16.mxu0 %v3130_v20  ;;  %2652 = vmatprep.subr.bf16.mxu1 %v2756_v48 }
 0x55d   :  { %v2882_v15 = vpop.eup %2881 }
 0x55e   :  { %v967_v55 = vmul.f32 %v2882_v15, %v3499_v7  ;;  %2653 = vmatpush3.bf16.msra.mxu1 %v2756_v48  ;;  %v2941_v48 = vld [vmem:[#allocation7 + $0x8] sm:$0xff] }
 0x55f   :  { %v1276_v61 = vpop.xlane.xlu1 %1275  ;;  %2654 = vmatprep.subr.bf16.mxu1 %v2757_v8 }
 0x560   :  { %v968_v18 = vpack.c.bf16 %v967_v55, %v966_v11  ;;  %2887 = vrcp.f32 %v1276_v61  ;;  %v2759_v55 = vld [vmem:[#allocation10 + $0x18] sm:$0xff]   ;;  %v2760_v61 = vld [vmem:[#allocation10 + $0x10] sm:$0xff]  }
 0x561   :  { %v2884_v22 = vpop.eup %2883  ;;  %2889 = vrcp.f32 %v1273_v14  ;;  %v2758_v14 = vld [vmem:[#allocation10 + $0x20] sm:$0xff]  }
 0x562   :  { %2599 = vmatmul.mubr.msk.bf16.vlgmr.msra.gmra.mxu0 %vm582_vm9, %v968_v18  ;;  %v1159_v26 = vmul.f32 %v2884_v22, %v3503_v60  ;;  %2655 = vmatpush3.bf16.msra.mxu1 %v2757_v8  ;;  %v2761_v18 = vld [vmem:[#allocation10 + $0x8] sm:$0xff]   ;;  %v2942_v8 = vld [vmem:[#allocation7 + $0x18] sm:$0xff] }
 0x563   :  { %2609 = vmatpush3.bf16.msra.mxu0 %v3265_v27  ;;  %2610 = vmatprep.mubr.msk.bf16.mxu0 %vm3132_vm0, %v3130_v20 }
 0x564   :  { %2620 = vmatprep.subr.bf16.mxu0 %v3130_v20  ;;  %2656 = vmatprep.subr.bf16.mxu1 %v2758_v14 }
 0x565   :  { %v2886_v23 = vpop.eup %2885 }
 0x566   :  { %v1160_v3 = vmul.f32 %v2886_v23, %v3508_v2  ;;  %2657 = vmatpush3.bf16.msra.mxu1 %v2758_v14  ;;  %v2765_v14 = vld [vmem:[#allocation11 + $0xe4] ss:$16 sps:$4 sm:$0xff]  }
 0x567   :  { %v1398_v7 = vpop.xlane.xlu1 %1397  ;;  %2658 = vmatprep.subr.bf16.mxu1 %v2759_v55 }
 0x568   :  { %v1161_v28 = vpack.c.bf16 %v1160_v3, %v1159_v26  ;;  %2891 = vrcp.f32 %v1398_v7  ;;  %v2762_v26 = vld [vmem:[#allocation10] sm:$0xff]  }
 0x56a   :  { %2611 = vmatmul.mubr.msk.bf16.vlgmr.msra.gmra.mxu0 %vm582_vm9, %v1161_v28  ;;  %2659 = vmatpush3.bf16.msra.mxu1 %v2759_v55 }
 0x56b   :  { %v1516_v29 = vpop.xlane.xlu1 %1515  ;;  %2622 = vmatprep.mubr.msk.bf16.mxu0 %vm3132_vm0, %v3130_v20  ;;  %2660 = vmatprep.subr.bf16.mxu1 %v2760_v61 }
 0x56d   :  { %v2888_v32 = vpop.eup %2887 }
 0x56e   :  { %v2890_v12 = vpop.eup %2889  ;;  %v1280_v35 = vmul.f32 %v2888_v32, %v3518_v41  ;;  %2661 = vmatpush3.bf16.msra.mxu1 %v2760_v61 }
 0x56f   :  { %v1519_v27 = vpop.xlane.xlu1 %1518  ;;  %v1279_v0 = vmul.f32 %v2890_v12, %v3513_v33  ;;  %2662 = vmatprep.subr.bf16.mxu1 %v2761_v18 }
 0x571   :  { %v1281_v60 = vpack.c.bf16 %v1280_v35, %v1279_v0 }
 0x572   :  { %2663 = vmatpush3.bf16.msra.mxu1 %v2761_v18 }
 0x573   :  { %v1284_v40 = vpop.permute.xlu1 %1283  ;;  %2664 = vmatprep.subr.bf16.mxu1 %v2762_v26 }
 0x574   :  { %2621 = vmatpush3.bf16.msra.mxu0 %v1284_v40 }
 0x575   :  { %2632 = vmatprep.subr.bf16.mxu0 %v3130_v20  ;;  %v2892_v41 = vpop.eup %2891 }
 0x576   :  { %v1402_v45 = vmul.f32 %v2892_v41, %v3522_v42  ;;  %2665 = vmatpush3.bf16.msra.mxu1 %v2762_v26 }
 0x577   :  { %2623 = vmatmul.mubr.msk.bf16.vlgmr.msra.gmra.mxu0 %vm582_vm9, %v1281_v60 }
 0x578   :  { %2634 = vmatprep.mubr.msk.bf16.mxu0 %vm3132_vm0, %v3130_v20 }
 0x588   :  { %v1395_v2 = vpop.xlane.xlu0 %1394 }
 0x589   :  { %2893 = vrcp.f32 %v1395_v2 }
 0x58a   :  { %2895 = vrcp.f32 %v1519_v27 }
 0x58b   :  { %2897 = vrcp.f32 %v1516_v29 }
 0x58c   :  { %v1405_v44 = vpop.permute.xlu0 %1404 }
 0x58d   :  { %2633 = vmatpush3.bf16.msra.mxu0 %v1405_v44 }
 0x58e   :  { %2644 = vmatprep.subr.bf16.mxu0 %v3130_v20 }
 0x590   :  { %v1526_v47 = vpop.permute.xlu0 %1525 }
 0x596   :  { %v2894_v33 = vpop.eup %2893 }
 0x597   :  { %v1401_v17 = vmul.f32 %v2894_v33, %v3545_v24  ;;  %v2896_v46 = vpop.eup %2895 }
 0x598   :  { %v2898_v16 = vpop.eup %2897  ;;  %v1523_v49 = vmul.f32 %v2896_v46, %v3537_v9 }
 0x599   :  { %v1403_v34 = vpack.c.bf16 %v1402_v45, %v1401_v17  ;;  %v1522_v21 = vmul.f32 %v2898_v16, %v3528_v25 }
 0x59b   :  { %2635 = vmatmul.mubr.msk.bf16.vlgmr.msra.gmra.mxu0 %vm582_vm9, %v1403_v34  ;;  %v1524_v19 = vpack.c.bf16 %v1523_v49, %v1522_v21 }
 0x59c   :  { %2645 = vmatpush3.bf16.msra.mxu0 %v1526_v47  ;;  %2646 = vmatprep.mubr.msk.bf16.mxu0 %vm3132_vm0, %v3130_v20 }
 0x59d   :  { %1975 = vmatprep.subr.bf16.mxu0 %v2765_v14 }
 0x5a2   :  { %v3591_v30 = vpop.f32.mrf.mxu0 }
 0x5a3   :  { %2647 = vmatmul.mubr.msk.bf16.vlgmr.msra.gmra.mxu0 %vm582_vm9, %v1524_v19 }
 0x5a4   :  { %v2564_v42 = vpop.f32.mrf.mxu0  ;;  %2007 = vmatprep.mubr.bf16.mxu0 %v3129_v39 }
 0x5a6   :  { %v3595_v50 = vpop.f32.mrf.mxu0 }
 0x5a8   :  { %v2565_v24 = vpop.f32.mrf.mxu0 }
 0x612   :  { %v767_v53 = vpop.f32.mrf.mxu0 }
 0x614   :  { %v2576_v31 = vpop.f32.mrf.mxu0 }
 0x616   :  { %v770_v6 = vpop.f32.mrf.mxu0 }
 0x617   :  { %v2693_v54 = vpack.i.bf16 %v770_v6, %v767_v53 }
 0x618   :  { %v2577_v20 = vpop.f32.mrf.mxu0 }
 0x619   :  { %2694 = vrot.lane.b32.xlu0 %v2693_v54, %s3134_s29 }
 0x61a   :  { %v888_v9 = vpop.f32.mrf.mxu0 }
 0x61c   :  { %v2588_v25 = vpop.f32.mrf.mxu0 }
 0x61e   :  { %v891_v38 = vpop.f32.mrf.mxu0 }
 0x61f   :  { %v2698_v37 = vpack.i.bf16 %v891_v38, %v888_v9 }
 0x620   :  { %v2589_v56 = vpop.f32.mrf.mxu0 }
 0x621   :  { %2699 = vrot.lane.b32.xlu1 %v2698_v37, %s3126_s1 }
 0x622   :  { %v1009_v57 = vpop.f32.mrf.mxu0 }
 0x624   :  { %v2600_v43 = vpop.f32.mrf.mxu0 }
 0x626   :  { %v1012_v62 = vpop.f32.mrf.mxu0 }
 0x627   :  { %v2703_v63 = vpack.i.bf16 %v1012_v62, %v1009_v57 }
 0x628   :  { %v2601_v1 = vpop.f32.mrf.mxu0 }
 0x629   :  { %2704 = vrot.lane.b32.xlu1 %v2703_v63, %s3133_s26  ;;  %v2939_v1 = vld [vmem:[#allocation7] sm:$0xff] }
 0x62a   :  { %v3600_v36 = vpop.f32.mrf.mxu0 }
 0x62c   :  { %v2612_v4 = vpop.f32.mrf.mxu0 }
 0x62e   :  { %v3602_v5 = vpop.f32.mrf.mxu0 }
 0x630   :  { %v2613_v59 = vpop.f32.mrf.mxu0 }
 0x631   :  { %v2940_v59 = vld [vmem:[#allocation7 + $0x10] sm:$0xff] }
 0x637   :  { %v1323_v51 = vpop.f32.mrf.mxu0 }
 0x639   :  { %v2624_v10 = vpop.f32.mrf.mxu0 }
 0x63b   :  { %v1326_v13 = vpop.f32.mrf.mxu0 }
 0x63c   :  { %v2708_v15 = vpack.i.bf16 %v1326_v13, %v1323_v51  ;;  %v2763_v13 = vld [vmem:[#allocation11 + $0xe0] ss:$16 sps:$4 sm:$0xff]  }
 0x63d   :  { %v2625_v11 = vpop.f32.mrf.mxu0  ;;  %1976 = vmatpush1.bf16.msra.mxu0 %v2763_v13 }
 0x63e   :  { %2709 = vrot.lane.b32.xlu0 %v2708_v15, %s3134_s29  ;;  %v2766_v15 = vld [vmem:[#allocation11 + $0xe8] ss:$16 sps:$4 sm:$0xff]   ;;  %v2768_v11 = vld [vmem:[#allocation11 + $0xec] ss:$16 sps:$4 sm:$0xff]  }
 0x63f   :  { %2028 = vmatprep.subr.bf16.mxu1 %v2768_v11 }
 0x65b   :  { %v1444_v22 = vpop.f32.mrf.mxu0 }
 0x65d   :  { %v2636_v23 = vpop.f32.mrf.mxu0 }
 0x65f   :  { %v1447_v3 = vpop.f32.mrf.mxu0 }
 0x660   :  { %v2713_v7 = vpack.i.bf16 %v1447_v3, %v1444_v22 }
 0x661   :  { %v2637_v28 = vpop.f32.mrf.mxu0 }
 0x662   :  { %2714 = vrot.lane.b32.xlu0 %v2713_v7, %s3126_s1 }
 0x663   :  { %v1565_v29 = vpop.f32.mrf.mxu0 }
 0x665   :  { %v2648_v32 = vpop.f32.mrf.mxu0 }
 0x667   :  { %v1568_v27 = vpop.f32.mrf.mxu0 }
 0x668   :  { %v2718_v12 = vpack.i.bf16 %v1568_v27, %v1565_v29 }
 0x669   :  { %v2649_v35 = vpop.f32.mrf.mxu0 }
 0x66a   :  { %2719 = vrot.lane.b32.xlu1 %v2718_v12, %s3133_s26 }
 0x68b   :  { %v2695_v40 = vpop.permute.xlu0 %2694 }
 0x68c   :  { %v2697_v60 = vunpack.i.h.bf16 %v2695_v40  ;;  %v2696_v2 = vunpack.i.l.bf16 %v2695_v40 }
 0x68e   :  { %v1041_v17 = vsel %vm534_vm2, %v3595_v50, %v2697_v60  ;;  %v1040_v45 = vsel %vm534_vm2, %v3591_v30, %v2696_v2  ;;  %v2771_v60 = vld [vmem:[#allocation11 + $0xc4] ss:$16 sps:$4 sm:$0xff]   ;;  %v2774_v2 = vld [vmem:[#allocation11 + $0xcc] ss:$16 sps:$4 sm:$0xff]  }
 0x68f   :  { %1977 = vmatprep.subr.bf16.mxu0 %v2771_v60 }
 0x693   :  { %v2700_v0 = vpop.permute.xlu1 %2699 }
 0x694   :  { %v2702_v44 = vunpack.i.h.bf16 %v2700_v0  ;;  %v2701_v41 = vunpack.i.l.bf16 %v2700_v0 }
 0x696   :  { %v1043_v47 = vsel %vm1042_vm13, %v1040_v45, %v2701_v41  ;;  %v1044_v16 = vsel %vm1042_vm13, %v1041_v17, %v2702_v44  ;;  %v2769_v44 = vld [vmem:[#allocation11 + $0xc0] ss:$16 sps:$4 sm:$0xff]   ;;  %v2772_v41 = vld [vmem:[#allocation11 + $0xc8] ss:$16 sps:$4 sm:$0xff]   ;;  %v2780_v17 = vld [vmem:[#allocation11 + $0xac] ss:$16 sps:$4 sm:$0xff]  }
 0x697   :  { %1978 = vmatpush1.bf16.msra.mxu0 %v2769_v44  ;;  %v2775_v45 = vld [vmem:[#allocation11 + $0xa0] ss:$16 sps:$4 sm:$0xff]  }
 0x69b   :  { %v2705_v33 = vpop.permute.xlu1 %2704 }
 0x69c   :  { %v2707_v34 = vunpack.i.h.bf16 %v2705_v33  ;;  %v2706_v46 = vunpack.i.l.bf16 %v2705_v33  ;;  %v2777_v33 = vld [vmem:[#allocation11 + $0xa4] ss:$16 sps:$4 sm:$0xff]  }
 0x69d   :  { %1979 = vmatprep.subr.bf16.mxu0 %v2777_v33 }
 0x69e   :  { %v1046_v49 = vsel %vm1045_vm14, %v1043_v47, %v2706_v46  ;;  %v1047_v21 = vsel %vm1045_vm14, %v1044_v16, %v2707_v34  ;;  %v2778_v34 = vld [vmem:[#allocation11 + $0xa8] ss:$16 sps:$4 sm:$0xff]   ;;  %1980 = vmatpush1.bf16.msra.mxu0 %v2775_v45  ;;  %v2783_v46 = vld [vmem:[#allocation11 + $0x84] ss:$16 sps:$4 sm:$0xff]   ;;  %v2786_v47 = vld [vmem:[#allocation11 + $0x8c] ss:$16 sps:$4 sm:$0xff]  }
 0x69f   :  { %v1602_v19 = vpack.c.bf16 %v1047_v21, %v1046_v49  ;;  %v2781_v16 = vld [vmem:[#allocation11 + $0x80] ss:$16 sps:$4 sm:$0xff]   ;;  %v2784_v49 = vld [vmem:[#allocation11 + $0x88] ss:$16 sps:$4 sm:$0xff]   ;;  %1981 = vmatprep.subr.bf16.mxu0 %v2783_v46  ;;  %v2789_v21 = vld [vmem:[#allocation11 + $0x64] ss:$16 sps:$4 sm:$0xff]  }
 0x6a0   :  { %v2811_v45 = vld [vmem:[#allocation13 + $0x78] sm:$0xff]   ;;  %v2815_v46 = vld [vmem:[#allocation13 + $0x68] sm:$0xff]  }
 0x6a1   :  { %2666 = vmatprep.mubr.bf16.mxu1 %v1602_v19  ;;  %v2787_v19 = vld [vmem:[#allocation11 + $0x60] ss:$16 sps:$4 sm:$0xff]  }
 0x6a2   :  { %1982 = vmatpush1.bf16.msra.mxu0 %v2781_v16  ;;  %v2817_v16 = vld [vmem:[#allocation13 + $0x60] sm:$0xff]  }
 0x6a3   :  { %1983 = vmatprep.subr.bf16.mxu0 %v2789_v21  ;;  %v2820_v21 = vld [vmem:[#allocation13 + $0x18] sm:$0xff]  }
 0x6a6   :  { %1984 = vmatpush1.bf16.msra.mxu0 %v2787_v19  ;;  %v2821_v19 = vld [vmem:[#allocation13 + $0x50] sm:$0xff]  }
 0x6b0   :  { %v2710_v42 = vpop.permute.xlu0 %2709 }
 0x6b1   :  { %v2712_v53 = vunpack.i.h.bf16 %v2710_v42  ;;  %v2711_v31 = vunpack.i.l.bf16 %v2710_v42  ;;  %v2790_v42 = vld [vmem:[#allocation11 + $0x68] ss:$16 sps:$4 sm:$0xff]  }
 0x6b3   :  { %v1597_v30 = vsel %vm534_vm2, %v3602_v5, %v2712_v53  ;;  %v1596_v20 = vsel %vm534_vm2, %v3600_v36, %v2711_v31  ;;  %v2795_v53 = vld [vmem:[#allocation11 + $0x44] ss:$16 sps:$4 sm:$0xff]   ;;  %v2798_v31 = vld [vmem:[#allocation11 + $0x4c] ss:$16 sps:$4 sm:$0xff]  }
 0x6b4   :  { %1985 = vmatprep.subr.bf16.mxu0 %v2795_v53  ;;  %v2824_v53 = vld [vmem:[#allocation13 + $0x8] sm:$0xff]  }
 0x6d4   :  { %v2715_v24 = vpop.permute.xlu0 %2714 }
 0x6d5   :  { %v2717_v50 = vunpack.i.h.bf16 %v2715_v24  ;;  %v2716_v6 = vunpack.i.l.bf16 %v2715_v24  ;;  %v2792_v24 = vld [vmem:[#allocation11 + $0x6c] ss:$16 sps:$4 sm:$0xff]  }
 0x6d7   :  { %v1598_v38 = vsel %vm1042_vm13, %v1596_v20, %v2716_v6  ;;  %v1599_v37 = vsel %vm1042_vm13, %v1597_v30, %v2717_v50  ;;  %v2793_v50 = vld [vmem:[#allocation11 + $0x40] ss:$16 sps:$4 sm:$0xff]   ;;  %v2796_v6 = vld [vmem:[#allocation11 + $0x48] ss:$16 sps:$4 sm:$0xff]   ;;  %v2804_v30 = vld [vmem:[#allocation11 + $0x2c] ss:$16 sps:$4 sm:$0xff]  }
 0x6d8   :  { %1986 = vmatpush1.bf16.msra.mxu0 %v2793_v50  ;;  %v2799_v20 = vld [vmem:[#allocation11 + $0x20] ss:$16 sps:$4 sm:$0xff]  }
 0x6d9   :  { %v2826_v50 = vld [vmem:[#allocation13] sm:$0xff]  }
 0x6dc   :  { %v2720_v54 = vpop.permute.xlu1 %2719 }
 0x6dd   :  { %v2722_v9 = vunpack.i.h.bf16 %v2720_v54  ;;  %v2721_v25 = vunpack.i.l.bf16 %v2720_v54  ;;  %v2801_v54 = vld [vmem:[#allocation11 + $0x24] ss:$16 sps:$4 sm:$0xff]  }
 0x6de   :  { %1987 = vmatprep.subr.bf16.mxu0 %v2801_v54 }
 0x6df   :  { %v1600_v56 = vsel %vm1045_vm14, %v1598_v38, %v2721_v25  ;;  %v1601_v57 = vsel %vm1045_vm14, %v1599_v37, %v2722_v9  ;;  %v2802_v9 = vld [vmem:[#allocation11 + $0x28] ss:$16 sps:$4 sm:$0xff]   ;;  %v2807_v25 = vld [vmem:[#allocation11 + $0x4] ss:$16 sps:$4 sm:$0xff]   ;;  %v2810_v38 = vld [vmem:[#allocation11 + $0xc] ss:$16 sps:$4 sm:$0xff]   ;;  %1988 = vmatpush1.bf16.msra.mxu0 %v2799_v20 }
 0x6e0   :  { %v1603_v43 = vpack.c.bf16 %v1601_v57, %v1600_v56  ;;  %v2805_v37 = vld [vmem:[#allocation11] ss:$16 sps:$4 sm:$0xff]   ;;  %v2808_v56 = vld [vmem:[#allocation11 + $0x8] ss:$16 sps:$4 sm:$0xff]   ;;  %1989 = vmatprep.subr.bf16.mxu0 %v2807_v25 }
 0x6e2   :  { %2667 = vmatmul.mubr.bf16.vlgmr.msra.gmra.mxu1 %v1603_v43 }
 0x6e3   :  { %2060 = vmatprep.mubr.bf16.mxu1 %v3129_v39  ;;  %2029 = vmatpush1.bf16.msra.mxu1 %v2766_v15  ;;  %v1767_v15 = vsub.s32 2, %v3240_v58 }
 0x6e4   :  { %2030 = vmatprep.subr.bf16.mxu1 %v2774_v2  ;;  %1990 = vmatpush1.bf16.msra.mxu0 %v2805_v37 }
 0x6e5   :  { %2506 = vmatprep.subr.bf16.mxu0 %v2811_v45 }
 0x6e7   :  { %2031 = vmatpush1.bf16.msra.mxu1 %v2772_v41 }
 0x6e8   :  { %2032 = vmatprep.subr.bf16.mxu1 %v2780_v17 }
 0x6eb   :  { %2033 = vmatpush1.bf16.msra.mxu1 %v2778_v34  ;;  %v2813_v34 = vld [vmem:[#allocation13 + $0x70] sm:$0xff]  }
 0x6ec   :  { %2034 = vmatprep.subr.bf16.mxu1 %v2786_v47  ;;  %v2816_v47 = vld [vmem:[#allocation13 + $0x28] sm:$0xff]  }
 0x6ef   :  { %2035 = vmatpush1.bf16.msra.mxu1 %v2784_v49  ;;  %v2818_v49 = vld [vmem:[#allocation13 + $0x20] sm:$0xff]  }
 0x6f0   :  { %2036 = vmatprep.subr.bf16.mxu1 %v2792_v24  ;;  %v2823_v24 = vld [vmem:[#allocation13 + $0x48] sm:$0xff]  }
 0x6f3   :  { %2037 = vmatpush1.bf16.msra.mxu1 %v2790_v42  ;;  %v2822_v42 = vld [vmem:[#allocation13 + $0x10] sm:$0xff]  }
 0x6f4   :  { %2038 = vmatprep.subr.bf16.mxu1 %v2798_v31  ;;  %v2825_v31 = vld [vmem:[#allocation13 + $0x40] sm:$0xff]  }
 0x6f7   :  { %2039 = vmatpush1.bf16.msra.mxu1 %v2796_v6 }
 0x6f8   :  { %2040 = vmatprep.subr.bf16.mxu1 %v2804_v30 }
 0x6fb   :  { %2041 = vmatpush1.bf16.msra.mxu1 %v2802_v9 }
 0x6fc   :  { %2042 = vmatprep.subr.bf16.mxu1 %v2810_v38 }
 0x6ff   :  { %2043 = vmatpush1.bf16.msra.mxu1 %v2808_v56 }
 0x7a2   :  { %v2668_v62 = vpop.f32.mrf.mxu1 }
 0x7a3   :  { %v3627_v52 = vadd.f32 %v2940_v59, %v2668_v62 }
 0x7a4   :  { %v1702_v63 = vpop.f32.mrf.mxu1 }
 0x7a5   :  { %v3624_v4 = vadd.f32 %v2939_v1, %v1702_v63 }
 0x7a6   :  { %v2669_v36 = vpop.f32.mrf.mxu1 }
 0x7a7   :  { %1721 = vadd.xlane.f32.xlu0 %v3624_v4  ;;  %v3633_v10 = vadd.f32 %v2942_v8, %v2669_v36 }
 0x7a8   :  { %v1705_v5 = vpop.f32.mrf.mxu1 }
 0x7a9   :  { %v3629_v51 = vadd.f32 %v2941_v48, %v1705_v5 }
 0x7ab   :  { %1725 = vadd.xlane.f32.xlu0 %v3627_v52  ;;  %1723 = vadd.xlane.f32.xlu1 %v3629_v51 }
 0x7af   :  { %1727 = vadd.xlane.f32.xlu0 %v3633_v10 }
 0x830   :  { %v1722_v55 = vpop.xlane.xlu0 %1721 }
 0x831   :  { %v1729_v61 = vmul.f32 0.0078125, %v1722_v55 }
 0x833   :  { %v3637_v18 = vsub.f32 %v3624_v4, %v1729_v61  ;;  %v2943_v61 = vld [vmem:[%s3687_s6] sm:$0xf]  ;;  %s3136_s6 = smov [#allocation14]  }
 0x834   :  { %v1726_v22 = vpop.xlane.xlu0 %1725  ;;  %v1724_v23 = vpop.xlane.xlu1 %1723  ;;  %s2335_s11 = sshll.u32 %s3136_s6, 4  ;;  %s2336_s11 = int_to_ptr.vmem [resolvable:$true] %s2335_s11 }
 0x835   :  { %v1731_v26 = vmul.f32 0.0078125, %v1726_v22  ;;  %v1730_v3 = vmul.f32 0.0078125, %v1724_v23  ;;  %v1737_v7 = vmul.f32 %v3637_v18, %v3637_v18  ;;  %v1768_v22 = vrot.slane %v2943_v61, %v1767_v15  ;;  %s3084_s12 = scalar_lea.vmem %s2336_s11, 512  ;;  %p3089_p8 = scmp.lt.s32.totalorder %s2336_s11, %s2336_s11 }
 0x836   :  { %v1775_v23 = vsub.s32 3, %v3240_v58  ;;  %p3085_p7 = scmp.ne.s32.totalorder %s2336_s11, %s3084_s12  ;;  %p3090_p9 = scmp.lt.s32.totalorder %s3084_s12, %s3084_s12 }
 0x837   :  { %v3642_v28 = vsub.f32 %v3627_v52, %v1731_v26  ;;  %v3645_v29 = vsub.f32 %v3629_v51, %v1730_v3  ;;  %1741 = vadd.xlane.f32.xlu0 %v1737_v7 }
 0x838   :  { %v1728_v32 = vpop.xlane.xlu0 %1727  ;;  %p3091_p10 = por %p3090_p9, %p3089_p8 }
 0x839   :  { %v1732_v27 = vmul.f32 0.0078125, %v1728_v32  ;;  %v1739_v12 = vmul.f32 %v3642_v28, %v3642_v28  ;;  %v1738_v35 = vmul.f32 %v3645_v29, %v3645_v29  ;;  %v1776_v32 = vrot.slane %v2943_v61, %v1775_v23 }
 0x83a   :  { %p3092_p11 = pnand %p3091_p10, %p3085_p7 }
 0x83b   :  { %v3652_v40 = vsub.f32 %v3633_v10, %v1732_v27  ;;  %1745 = vadd.xlane.f32.xlu0 %v1739_v12  ;;  %1743 = vadd.xlane.f32.xlu1 %v1738_v35 }
 0x83d   :  { %v1740_v0 = vmul.f32 %v3652_v40, %v3652_v40 }
 0x83f   :  { %1747 = vadd.xlane.f32.xlu1 %v1740_v0 }
 0x8c0   :  { %v1742_v57 = vpop.xlane.xlu0 %1741 }
 0x8c1   :  { %v1749_v43 = vmul.f32 0.0078125, %v1742_v57 }
 0x8c3   :  { %v1753_v62 = vadd.f32 1e-05, %v1749_v43 }
 0x8c4   :  { %v1746_v63 = vpop.xlane.xlu0 %1745  ;;  %v1744_v1 = vpop.xlane.xlu1 %1743 }
 0x8c5   :  { %2899 = vrsqrt.f32 %v1753_v62  ;;  %v1751_v36 = vmul.f32 0.0078125, %v1746_v63  ;;  %v1750_v5 = vmul.f32 0.0078125, %v1744_v1 }
 0x8c7   :  { %v1754_v59 = vadd.f32 1e-05, %v1750_v5  ;;  %v1755_v48 = vadd.f32 1e-05, %v1751_v36 }
 0x8c8   :  { %v1748_v8 = vpop.xlane.xlu1 %1747 }
 0x8c9   :  { %v1752_v13 = vmul.f32 0.0078125, %v1748_v8  ;;  %2901 = vrsqrt.f32 %v1754_v59 }
 0x8ca   :  { %2903 = vrsqrt.f32 %v1755_v48 }
 0x8cb   :  { %v1756_v14 = vadd.f32 1e-05, %v1752_v13 }
 0x8cd   :  { %2905 = vrsqrt.f32 %v1756_v14 }
 0x8d2   :  { %v2900_v11 = vpop.eup %2899 }
 0x8d3   :  { %v1761_v55 = vmul.f32 %v2900_v11, %v3637_v18 }
 0x8d5   :  { %v1769_v7 = vmul.f32 %v1768_v22, %v1761_v55 }
 0x8d6   :  { %v2902_v26 = vpop.eup %2901 }
 0x8d7   :  { %v1762_v3 = vmul.f32 %v2902_v26, %v3645_v29  ;;  %v2904_v27 = vpop.eup %2903  ;;  %v1777_v60 = vadd.f32 %v1776_v32, %v1769_v7 }
 0x8d8   :  { %v1763_v18 = vmul.f32 %v2904_v27, %v3642_v28  ;;  %v2814_v28 = vld [vmem:[#allocation13 + $0x30] sm:$0xff]  }
 0x8d9   :  { %v1770_v35 = vmul.f32 %v1768_v22, %v1762_v3 }
 0x8da   :  { %v2906_v12 = vpop.eup %2905  ;;  %v1771_v33 = vmul.f32 %v1768_v22, %v1763_v18 }
 0x8db   :  { %v1764_v0 = vmul.f32 %v2906_v12, %v3652_v40  ;;  %v1778_v2 = vadd.f32 %v1776_v32, %v1770_v35  ;;  %v2812_v40 = vld [vmem:[#allocation13 + $0x38] sm:$0xff]  }
 0x8dc   :  { %v1779_v29 = vadd.f32 %v1776_v32, %v1771_v33 }
 0x8dd   :  { %v1781_v44 = vpack.c.bf16 %v1778_v2, %v1777_v60  ;;  %v1772_v41 = vmul.f32 %v1768_v22, %v1764_v0 }
 0x8df   :  { %2008 = vmatmul.mubr.bf16.vlgmr.msra.gmra.mxu0 %v1781_v44  ;;  %2061 = vmatmul.mubr.bf16.vlgmr.msra.gmra.mxu1 %v1781_v44  ;;  %v1780_v58 = vadd.f32 %v1776_v32, %v1772_v41 }
 0x8e0   :  { %2017 = vmatprep.mubr.bf16.mxu0 %v3129_v39  ;;  %2070 = vmatprep.mubr.bf16.mxu1 %v3129_v39  ;;  %v2819_v39 = vld [vmem:[#allocation13 + $0x58] sm:$0xff]  }
 0x8e1   :  { %v1782_v17 = vpack.c.bf16 %v1780_v58, %v1779_v29  ;;  %2507 = vmatpush3.bf16.msra.mxu0 %v2812_v40 }
 0x8e2   :  { %2508 = vmatprep.subr.bf16.mxu0 %v2813_v34 }
 0x8e5   :  { %2509 = vmatpush3.bf16.msra.mxu0 %v2814_v28 }
 0x8e6   :  { %2510 = vmatprep.subr.bf16.mxu0 %v2815_v46 }
 0x8e7   :  { %2018 = vmatmul.mubr.bf16.gmra.mxu0 %v1782_v17  ;;  %2071 = vmatmul.mubr.bf16.gmra.mxu1 %v1782_v17 }
 0x8e9   :  { %2511 = vmatpush3.bf16.msra.mxu0 %v2816_v47 }
 0x8ea   :  { %2512 = vmatprep.subr.bf16.mxu0 %v2817_v16 }
 0x8ed   :  { %2513 = vmatpush3.bf16.msra.mxu0 %v2818_v49 }
 0x8ee   :  { %2514 = vmatprep.subr.bf16.mxu0 %v2819_v39 }
 0x8f1   :  { %2515 = vmatpush3.bf16.msra.mxu0 %v2820_v21 }
 0x8f2   :  { %2516 = vmatprep.subr.bf16.mxu0 %v2821_v19 }
 0x8f5   :  { %2517 = vmatpush3.bf16.msra.mxu0 %v2822_v42 }
 0x8f6   :  { %2518 = vmatprep.subr.bf16.mxu0 %v2823_v24 }
 0x8f9   :  { %2519 = vmatpush3.bf16.msra.mxu0 %v2824_v53 }
 0x8fa   :  { %2520 = vmatprep.subr.bf16.mxu0 %v2825_v31 }
 0x8fd   :  { %2521 = vmatpush3.bf16.msra.mxu0 %v2826_v50 }
 0x99f   :  { %v2009_v6 = vpop.f32.mrf.mxu0  ;;  %v2062_v15 = vpop.f32.mrf.mxu1 }
 0x9a0   :  { %v2430_v54 = vmul.f32 -1.442695, %v2009_v6 }
 0x9a1   :  { %v2011_v30 = vpop.f32.mrf.mxu0  ;;  %v2064_v23 = vpop.f32.mrf.mxu1 }
 0x9a2   :  { %2907 = vpow2.f32 %v2430_v54  ;;  %v2431_v20 = vmul.f32 -1.442695, %v2011_v30 }
 0x9a3   :  { %v2013_v9 = vpop.f32.mrf.mxu0  ;;  %v2066_v27 = vpop.f32.mrf.mxu1 }
 0x9a4   :  { %2909 = vpow2.f32 %v2431_v20  ;;  %v2432_v25 = vmul.f32 -1.442695, %v2013_v9 }
 0x9a5   :  { %v2015_v38 = vpop.f32.mrf.mxu0  ;;  %v2068_v60 = vpop.f32.mrf.mxu1 }
 0x9a6   :  { %2911 = vpow2.f32 %v2432_v25  ;;  %v2433_v37 = vmul.f32 -1.442695, %v2015_v38 }
 0x9a7   :  { %v3667_v56 = vpop.f32.mrf.mxu0  ;;  %v2072_v41 = vpop.f32.mrf.mxu1 }
 0x9a8   :  { %2913 = vpow2.f32 %v2433_v37  ;;  %v2434_v57 = vmul.f32 -1.442695, %v3667_v56 }
 0x9a9   :  { %v2021_v43 = vpop.f32.mrf.mxu0  ;;  %v2074_v34 = vpop.f32.mrf.mxu1 }
 0x9aa   :  { %2915 = vpow2.f32 %v2434_v57  ;;  %v2435_v62 = vmul.f32 -1.442695, %v2021_v43 }
 0x9ab   :  { %v2023_v63 = vpop.f32.mrf.mxu0  ;;  %v2076_v42 = vpop.f32.mrf.mxu1 }
 0x9ac   :  { %2917 = vpow2.f32 %v2435_v62  ;;  %v2436_v1 = vmul.f32 -1.442695, %v2023_v63 }
 0x9ad   :  { %v2025_v36 = vpop.f32.mrf.mxu0 }
 0x9ae   :  { %2919 = vpow2.f32 %v2436_v1  ;;  %v2437_v5 = vmul.f32 -1.442695, %v2025_v36 }
 0x9af   :  { %v2908_v59 = vpop.eup %2907 }
 0x9b0   :  { %2921 = vpow2.f32 %v2437_v5  ;;  %v2105_v8 = vadd.f32 1.0, %v2908_v59 }
 0x9b1   :  { %v2910_v48 = vpop.eup %2909 }
 0x9b2   :  { %v2106_v13 = vadd.f32 1.0, %v2910_v48 }
 0x9b3   :  { %v2912_v14 = vpop.eup %2911 }
 0x9b4   :  { %2923 = vrcp.f32 %v2106_v13  ;;  %v2107_v11 = vadd.f32 1.0, %v2912_v14 }
 0x9b5   :  { %v2914_v55 = vpop.eup %2913  ;;  %2925 = vrcp.f32 %v2105_v8 }
 0x9b6   :  { %2927 = vrcp.f32 %v2107_v11  ;;  %v2108_v61 = vadd.f32 1.0, %v2914_v55 }
 0x9b7   :  { %v2916_v22 = vpop.eup %2915 }
 0x9b8   :  { %2929 = vrcp.f32 %v2108_v61  ;;  %v2109_v3 = vadd.f32 1.0, %v2916_v22 }
 0x9b9   :  { %v2918_v26 = vpop.eup %2917 }
 0x9ba   :  { %v2110_v7 = vadd.f32 1.0, %v2918_v26 }
 0x9bb   :  { %v2920_v32 = vpop.eup %2919 }
 0x9bc   :  { %2931 = vrcp.f32 %v2110_v7  ;;  %v2111_v12 = vadd.f32 1.0, %v2920_v32 }
 0x9bd   :  { %v2922_v35 = vpop.eup %2921  ;;  %2933 = vrcp.f32 %v2109_v3 }
 0x9be   :  { %2935 = vrcp.f32 %v2111_v12  ;;  %v2112_v0 = vadd.f32 1.0, %v2922_v35 }
 0x9c0   :  { %2937 = vrcp.f32 %v2112_v0 }
 0x9c1   :  { %v2924_v2 = vpop.eup %2923 }
 0x9c2   :  { %v2926_v18 = vpop.eup %2925  ;;  %v2130_v33 = vmul.f32 %v2924_v2, %v2011_v30  ;;  %v2078_v30 = vpop.f32.mrf.mxu1 }
 0x9c3   :  { %v2928_v44 = vpop.eup %2927  ;;  %v2129_v17 = vmul.f32 %v2926_v18, %v2009_v6 }
 0x9c4   :  { %v2131_v58 = vmul.f32 %v2928_v44, %v2013_v9  ;;  %v2138_v28 = vmul.f32 %v2130_v33, %v2064_v23 }
 0x9c5   :  { %v2930_v29 = vpop.eup %2929  ;;  %v2137_v16 = vmul.f32 %v2129_v17, %v2062_v15 }
 0x9c6   :  { %v2132_v45 = vmul.f32 %v2930_v29, %v2015_v38  ;;  %v2139_v40 = vmul.f32 %v2131_v58, %v2066_v27 }
 0x9c8   :  { %v2140_v46 = vmul.f32 %v2132_v45, %v2068_v60  ;;  %v2145_v19 = vpack.c.bf16 %v2139_v40, %v2137_v16 }
 0x9c9   :  { %v2932_v47 = vpop.eup %2931 }
 0x9ca   :  { %v2934_v49 = vpop.eup %2933  ;;  %v2146_v39 = vpack.c.bf16 %v2140_v46, %v2138_v28  ;;  %v2134_v24 = vmul.f32 %v2932_v47, %v2021_v43 }
 0x9cb   :  { %v2936_v21 = vpop.eup %2935  ;;  %v2133_v50 = vmul.f32 %v2934_v49, %v3667_v56 }
 0x9cc   :  { %v2135_v53 = vmul.f32 %v2936_v21, %v2023_v63  ;;  %2309 = vmatprep.mubr.bf16.mxu0 %v2146_v39  ;;  %v2142_v20 = vmul.f32 %v2134_v24, %v2074_v34 }
 0x9cd   :  { %v2938_v31 = vpop.eup %2937  ;;  %2310 = vmatmul.mubr.bf16.vlgmr.msra.gmra.mxu0 %v2145_v19  ;;  %v2141_v25 = vmul.f32 %v2133_v50, %v2072_v41 }
 0x9ce   :  { %v2136_v6 = vmul.f32 %v2938_v31, %v2025_v36  ;;  %v2143_v54 = vmul.f32 %v2135_v53, %v2076_v42 }
 0x9d0   :  { %v2144_v9 = vmul.f32 %v2136_v6, %v2078_v30  ;;  %v2147_v37 = vpack.c.bf16 %v2143_v54, %v2141_v25 }
 0x9d2   :  { %v2148_v38 = vpack.c.bf16 %v2144_v9, %v2142_v20 }
 0x9d4   :  { %2317 = vmatprep.mubr.bf16.mxu0 %v2148_v38 }
 0x9d5   :  { %2318 = vmatmul.mubr.bf16.gmra.mxu0 %v2147_v37 }
 0xa8d   :  { %v2522_v57 = vpop.f32.mrf.mxu0 }
 0xa8f   :  { %v2523_v62 = vpop.f32.mrf.mxu0 }
 0xa90   :  { %v2524_v1 = vadd.f32 %v2523_v62, %v2522_v57 }
 0xa91   :  { %v2525_v43 = vpop.f32.mrf.mxu0 }
 0xa92   :  { %v2312_v63 = vadd.f32 %v2524_v1, %v3624_v4 }
 0xa93   :  { %v2526_v5 = vpop.f32.mrf.mxu0 }
 0xa94   :  { %2326 = vst [vmem:[#allocation14] sm:$0xff] %v2312_v63  ;;  %v2527_v56 = vadd.f32 %v2526_v5, %v2525_v43 }
 0xa95   :  { %v2528_v59 = vpop.f32.mrf.mxu0 }
 0xa96   :  { %v2315_v36 = vadd.f32 %v2527_v56, %v3629_v51 }
 0xa97   :  { %v2529_v48 = vpop.f32.mrf.mxu0 }
 0xa98   :  { %2327 = vst [vmem:[#allocation14 + $0x8] sm:$0xff] %v2315_v36  ;;  %v2530_v8 = vadd.f32 %v2529_v48, %v2528_v59 }
 0xa99   :  { %v2531_v13 = vpop.f32.mrf.mxu0 }
 0xa9a   :  { %v2320_v14 = vadd.f32 %v2530_v8, %v3627_v52 }
 0xa9b   :  { %v2532_v15 = vpop.f32.mrf.mxu0 }
 0xa9c   :  { %2328 = vst [vmem:[#allocation14 + $0x10] sm:$0xff] %v2320_v14  ;;  %v2533_v11 = vadd.f32 %v2532_v15, %v2531_v13 }
 0xa9e   :  { %v2323_v55 = vadd.f32 %v2533_v11, %v3633_v10 }
 0xaa0   :  { %2329 = vst [vmem:[#allocation14 + $0x18] sm:$0xff] %v2323_v55 }
 0xaa1   :  { %3095 = shalt.err (!%p3092_p11)
}
 0xaa2   :  { %2341 = dma.vmem_to_hbm [thread:$0]  %s2336_s11, 512, %s3690_s9, [#allocation4], %s3116_s14, %s3116_s14, %s3117_s15  }
 0xaa3   :  { %3112 = dma.done.wait [#allocation4], 512  }
 0xaa4   :  { %3113 = vsyncadd [#allocation4], 4294966784 }
 0xaa5   :  { %2345 = vsyncpa [#allocation3], 1 }
 0xaa6   :  { %2346 = vsyncpa [#allocation6], 1 }
 0xaa7   :  { %2347 = vsyncpa [#allocation9], 1 }
 0xaa8   :  { %2348 = vsyncpa [#allocation12], 1 }
 0xaa9   :  { %2349 = vsyncpa [#allocation4], 1 }

</bundles_post_ra>
